<compile_context>
chip_gen: v7x
topology: tpu7x:2x2x1
jax: 0.10.0
libtpu: 0.0.40
codegen_flags: <defaults>
</compile_context>

<pallas_src>
import jax
import jax.numpy as jnp
from jax.experimental import pallas as pl
from jax.experimental.pallas import tpu as pltpu


# ----------------------------------------------------------------------------
# Pallas kernel: one NGCF propagation layer, (row-tile, K-chunk) grid.
# ----------------------------------------------------------------------------
def ngcf_layer_kernel(astk_ref, eg_ref, erow_ref, w12_ref, b12_ref,
                      new_e_ref, norm_e_ref, acc_ref):
    k = pl.program_id(1)

    @pl.when(k == 0)
    def _init():
        acc_ref[...] = jnp.zeros_like(acc_ref)

    # Fused graph propagation: the (2*tm, tk) block stacks the A_hat row tile on
    # top of the A row tile, so both share one MXU RHS push of the E K-chunk.
    acc_ref[...] += jnp.dot(astk_ref[...], eg_ref[...],
                            preferred_element_type=jnp.float32)

    @pl.when(k == pl.num_programs(1) - 1)
    def _finalize():
        tm, D = new_e_ref.shape
        s1 = acc_ref[pl.ds(0, tm), :]      # (A+I)_norm @ E  row tile
        s2 = acc_ref[pl.ds(tm, tm), :]     # A_norm     @ E  row tile
        e_row = erow_ref[...]

        # W1/W2 arrive as a single fused (2D, D) array (one DMA stream); the two
        # small (tm,D)x(D,D) dots are kept separate (avoids a minor-dim concat,
        # and this path is negligible next to the graph matmul above).
        w1 = w12_ref[pl.ds(0, D), :]
        w2 = w12_ref[pl.ds(D, D), :]
        z = (jnp.dot(s1, w1, preferred_element_type=jnp.float32)
             + jnp.dot(s2 * e_row, w2, preferred_element_type=jnp.float32)
             + b12_ref[...])

        # LeakyReLU(negative_slope=0.2)
        new_e = jnp.where(z >= 0, z, 0.2 * z)
        new_e_ref[...] = new_e.astype(new_e_ref.dtype)

        # F.normalize(p=2, dim=1): x / max(||x||, 1e-12) == x * rsqrt(max(||x||^2, 1e-24))
        sumsq = jnp.sum(new_e * new_e, axis=1, keepdims=True)
        inv = jax.lax.rsqrt(jnp.maximum(sumsq, 1e-24))
        norm_e_ref[...] = (new_e * inv).astype(norm_e_ref.dtype)


def ngcf_layer(A_stack, E, W12, b12, *, tm, tk, graph_dtype):
    """One NGCF layer. Returns (new_E, l2_normalized_new_E), both (N, D) f32."""
    N, D = E.shape
    assert A_stack.shape == (2 * N, N)
    assert N % tm == 0 and N % tk == 0
    grid = (N // tm, N // tk)

    E_g = E.astype(graph_dtype)   # low-precision copy for the big graph matmul

    return pl.pallas_call(
        ngcf_layer_kernel,
        out_shape=(jax.ShapeDtypeStruct((N, D), jnp.float32),
                   jax.ShapeDtypeStruct((N, D), jnp.float32)),
        grid_spec=pltpu.PrefetchScalarGridSpec(
            num_scalar_prefetch=0,
            grid=grid,
            in_specs=[
                pl.BlockSpec((2 * tm, tk), lambda i, k: (i, k)),  # [A_hat;A] row tile, K chunk
                pl.BlockSpec((tk, D), lambda i, k: (k, 0)),       # E K-chunk (graph dtype)
                pl.BlockSpec((tm, D), lambda i, k: (i, 0)),       # E row tile (f32, elementwise)
                pl.BlockSpec((2 * D, D), lambda i, k: (0, 0)),    # fused [W1; W2]
                pl.BlockSpec((1, D), lambda i, k: (0, 0)),        # fused b1 + b2
            ],
            out_specs=[
                pl.BlockSpec((tm, D), lambda i, k: (i, 0)),       # new E
                pl.BlockSpec((tm, D), lambda i, k: (i, 0)),       # normalized new E
            ],
            scratch_shapes=[pltpu.VMEM((2 * tm, D), jnp.float32)],
        ),
        compiler_params=pltpu.CompilerParams(
            dimension_semantics=("parallel", "arbitrary"),
            vmem_limit_bytes=48 * 1024 * 1024,
        ),
    )(A_stack, E_g, E, W12, b12)


# ----------------------------------------------------------------------------
# Full NGCF forward (glue in plain JAX, hot path in the Pallas kernel above).
# ----------------------------------------------------------------------------
def _pick_tile(n, target, multiple):
    """Largest t <= min(target, n), t % multiple == 0 and n % t == 0; else n."""
    t = min(target, n)
    t -= t % multiple
    while t >= multiple:
        if n % t == 0:
            return t
        t -= multiple
    return n


def ngcf_forward(A_hat, A, user_embed, item_embed, layer_weights,
                 user, pos_item, neg_item, n_user,
                 *, tm=128, tk=512, graph_dtype=jnp.bfloat16):
    E = jnp.concatenate([user_embed, item_embed], axis=0).astype(jnp.float32)
    N, D = E.shape
    tm = _pick_tile(N, tm, 8)
    tk = _pick_tile(N, tk, 128)

    # TODO(synk): torch.sparse.mm on the COO adjacency has no clean Pallas sparse
    # equivalent; the normalized adjacency is materialized dense and propagated
    # with a K-tiled MXU matmul (a block-sparse, scalar-prefetch-driven layout is
    # the next step for realistic graph sizes).
    # Interleave tm-row blocks of A_hat and A so ONE BlockSpec feeds both graph
    # matmuls (shared E RHS push), cast to bf16 to halve adjacency HBM traffic.
    A_stack = jnp.concatenate(
        [A_hat.reshape(N // tm, tm, N), A.reshape(N // tm, tm, N)], axis=1
    ).reshape(2 * N, N).astype(graph_dtype)

    all_embeddings = [E]
    for (W1, b1, W2, b2) in layer_weights:
        W12 = jnp.concatenate([W1, W2], axis=0).astype(jnp.float32)
        b12 = (b1 + b2).astype(jnp.float32)
        new_E, norm_E = ngcf_layer(A_stack, E, W12, b12,
                                   tm=tm, tk=tk, graph_dtype=graph_dtype)
        E = new_E
        all_embeddings.append(norm_E)

    all_embeddings = jnp.concatenate(all_embeddings, axis=1)
    user_embeddings = all_embeddings[:n_user, :]
    item_embeddings = all_embeddings[n_user:, :]
    return (user_embeddings[user, :],
            item_embeddings[pos_item, :],
            item_embeddings[neg_item, :])


# Pure-JAX reference (for correctness check only).
def ngcf_forward_ref(A_hat, A, user_embed, item_embed, layer_weights,
                     user, pos_item, neg_item, n_user):
    E = jnp.concatenate([user_embed, item_embed], axis=0)
    all_embeddings = [E]
    for (W1, b1, W2, b2) in layer_weights:
        nis = A_hat @ E
        nis = nis @ W1 + b1
        ni = (A @ E) * E
        ni = ni @ W2 + b2
        z = nis + ni
        E = jnp.where(z >= 0, z, 0.2 * z)
        norm = jnp.sqrt(jnp.sum(E * E, axis=1, keepdims=True))
        all_embeddings.append(E / jnp.maximum(norm, 1e-12))
    all_embeddings = jnp.concatenate(all_embeddings, axis=1)
    u = all_embeddings[:n_user, :][user, :]
    p = all_embeddings[n_user:, :][pos_item, :]
    n = all_embeddings[n_user:, :][neg_item, :]
    return u, p, n


# ----------------------------------------------------------------------------
# Parameter / input construction (deterministic, xavier-uniform like torch).
# ----------------------------------------------------------------------------
def xavier_uniform(key, shape):
    fan_in, fan_out = shape[0], shape[1]
    bound = (6.0 / (fan_in + fan_out)) ** 0.5
    return jax.random.uniform(key, shape, jnp.float32, -bound, bound)


def build_norm_adj(key, n_user, n_item):
    """Dense symmetric normalized adjacency D^-1/2 A D^-1/2 (and A+I variant)."""
    N = n_user + n_item
    R = (jax.random.uniform(key, (n_user, n_item)) < 0.1).astype(jnp.float32)
    adj = jnp.zeros((N, N), jnp.float32)
    adj = adj.at[:n_user, n_user:].set(R)
    adj = adj.at[n_user:, :n_user].set(R.T)

    def sym_norm(M):
        deg = jnp.sum(M, axis=1)
        d_inv_sqrt = jnp.where(deg > 0, 1.0 / jnp.sqrt(deg), 0.0)
        return M * d_inv_sqrt[:, None] * d_inv_sqrt[None, :]

    norm_adj = sym_norm(adj)
    norm_adj_plus_I = sym_norm(adj + jnp.eye(N, dtype=jnp.float32))
    return norm_adj_plus_I, norm_adj


if __name__ == "__main__":
    # Small config consistent with the module's __init__ (N=256 -> grid (2, 2)).
    n_user, n_item = 96, 160
    embed_size = 32
    layer_num = 2
    batch_size = 8

    key = jax.random.PRNGKey(0)
    keys = jax.random.split(key, 4 + 4 * layer_num)

    A_hat, A = build_norm_adj(keys[0], n_user, n_item)

    user_embed = xavier_uniform(keys[1], (n_user, embed_size))
    item_embed = xavier_uniform(keys[2], (n_item, embed_size))

    layer_weights = []
    for k in range(layer_num):
        kw = keys[3 + 4 * k: 3 + 4 * (k + 1)]
        W1 = xavier_uniform(kw[0], (embed_size, embed_size))
        b1 = xavier_uniform(kw[1], (1, embed_size))
        W2 = xavier_uniform(kw[2], (embed_size, embed_size))
        b2 = xavier_uniform(kw[3], (1, embed_size))
        layer_weights.append((W1, b1, W2, b2))

    idx_key = jax.random.split(key, 3)
    user = jax.random.randint(idx_key[0], (batch_size,), 0, n_user)
    pos_item = jax.random.randint(idx_key[1], (batch_size,), 0, n_item)
    neg_item = jax.random.randint(idx_key[2], (batch_size,), 0, n_item)

    common = (A_hat, A, user_embed, item_embed, layer_weights,
              user, pos_item, neg_item, n_user)

    # Production path: bf16 adjacency / graph-E, f32 accumulation + elementwise.
    u_b, p_b, n_b = ngcf_forward(*common, tm=128, tk=128)
    jax.block_until_ready((u_b, p_b, n_b))

    # Strict f32 path: verifies the kernel structure (tiling/accumulation) exactly.
    u_f, p_f, n_f = ngcf_forward(*common, tm=128, tk=128, graph_dtype=jnp.float32)
    jax.block_until_ready((u_f, p_f, n_f))

    # Pure-JAX reference.
    u_r, p_r, n_r = ngcf_forward_ref(*common)

    assert u_b.shape == (batch_size, embed_size * (layer_num + 1))
    assert jnp.allclose(u_f, u_r, atol=2e-5, rtol=2e-5)
    assert jnp.allclose(p_f, p_r, atol=2e-5, rtol=2e-5)
    assert jnp.allclose(n_f, n_r, atol=2e-5, rtol=2e-5)
    # bf16 adjacency/E with f32 accumulation: looser tolerance.
    assert jnp.allclose(u_b, u_r, atol=3e-2, rtol=3e-2)
    assert jnp.allclose(p_b, p_r, atol=3e-2, rtol=3e-2)
    assert jnp.allclose(n_b, n_r, atol=3e-2, rtol=3e-2)

    print("KERNEL_OK")
</pallas_src>

<mosaic_0001>
module attributes {stable_mosaic.version = 11 : i64} {
  func.func @ngcf_layer_kernel(%arg0: i32, %arg1: i32, %arg2: memref<256x128xbf16, #tpu.memory_space<vmem>>, %arg3: memref<128x32xbf16, #tpu.memory_space<vmem>>, %arg4: memref<128x32xf32, #tpu.memory_space<vmem>>, %arg5: memref<64x32xf32, #tpu.memory_space<vmem>>, %arg6: memref<1x32xf32, #tpu.memory_space<vmem>>, %arg7: memref<128x32xf32, #tpu.memory_space<vmem>>, %arg8: memref<128x32xf32, #tpu.memory_space<vmem>>, %arg9: memref<256x32xf32, #tpu.memory_space<vmem>>) attributes {dimension_semantics = [#tpu.dimension_semantics<parallel>, #tpu.dimension_semantics<arbitrary>], iteration_bounds = array<i64: 2, 2>, scalar_prefetch = 0 : i64, scratch_operands = 1 : i64, tpu.core_type = #tpu.core_type<tc>, window_params = [{transform_indices = @transform_0, window_bounds = array<i64: 256, 128>}, {transform_indices = @transform_1, window_bounds = array<i64: 128, 32>}, {transform_indices = @transform_2, window_bounds = array<i64: 128, 32>}, {pipeline_mode = #tpu.pipeline_mode<synchronous>, transform_indices = @transform_3, window_bounds = array<i64: 64, 32>}, {pipeline_mode = #tpu.pipeline_mode<synchronous>, transform_indices = @transform_4, window_bounds = array<i64: 1, 32>}, {transform_indices = @transform_5, window_bounds = array<i64: 128, 32>}, {transform_indices = @transform_6, window_bounds = array<i64: 128, 32>}]} {
    %c0_i32 = arith.constant 0 : i32
    %0 = arith.cmpi eq, %arg1, %c0_i32 : i32
    %1 = arith.extui %0 : i1 to i32
    %c0_i32_0 = arith.constant 0 : i32
    %2 = arith.cmpi ne, %1, %c0_i32_0 : i32
    scf.if %2 {
      %cst_9 = arith.constant 0.000000e+00 : f32
      %12 = vector.broadcast %cst_9 : f32 to vector<256x32xf32>
      %c0_10 = arith.constant 0 : index
      %c0_11 = arith.constant 0 : index
      %13 = vector.load %arg9[%c0_10, %c0_11] : memref<256x32xf32, #tpu.memory_space<vmem>>, vector<256x32xf32>
      tpu.vector_store %arg9[%c0_10, %c0_11], %12 {strides = array<i32>} : memref<256x32xf32, #tpu.memory_space<vmem>>, vector<256x32xf32>,
    } else {
    }
    %c0 = arith.constant 0 : index
    %c0_1 = arith.constant 0 : index
    %3 = vector.load %arg9[%c0, %c0_1] : memref<256x32xf32, #tpu.memory_space<vmem>>, vector<256x32xf32>
    %c0_2 = arith.constant 0 : index
    %c0_3 = arith.constant 0 : index
    %4 = vector.load %arg2[%c0_2, %c0_3] : memref<256x128xbf16, #tpu.memory_space<vmem>>, vector<256x128xbf16>
    %c0_4 = arith.constant 0 : index
    %c0_5 = arith.constant 0 : index
    %5 = vector.load %arg3[%c0_4, %c0_5] : memref<128x32xbf16, #tpu.memory_space<vmem>>, vector<128x32xbf16>
    %cst = arith.constant dense<0.000000e+00> : vector<256x32xf32>
    %6 = tpu.matmul %4, %5, %cst {dimension_numbers = #tpu.dot_dimension_numbers<[1], [0], [0], [1], [0, 0, 1, 1], [], []>} : vector<256x128xbf16>, vector<128x32xbf16>, vector<256x32xf32> -> vector<256x32xf32>
    %7 = arith.addf %3, %6 : vector<256x32xf32>
    %c0_6 = arith.constant 0 : index
    %c0_7 = arith.constant 0 : index
    %8 = vector.load %arg9[%c0_6, %c0_7] : memref<256x32xf32, #tpu.memory_space<vmem>>, vector<256x32xf32>
    tpu.vector_store %arg9[%c0_6, %c0_7], %7 {strides = array<i32>} : memref<256x32xf32, #tpu.memory_space<vmem>>, vector<256x32xf32>,
    %c1_i32 = arith.constant 1 : i32
    %9 = arith.cmpi eq, %arg1, %c1_i32 : i32
    %10 = arith.extui %9 : i1 to i32
    %c0_i32_8 = arith.constant 0 : i32
    %11 = arith.cmpi ne, %10, %c0_i32_8 : i32
    scf.if %11 {
      %c0_9 = arith.constant 0 : index
      %c0_10 = arith.constant 0 : index
      %12 = vector.load %arg9[%c0_9, %c0_10] : memref<256x32xf32, #tpu.memory_space<vmem>>, vector<128x32xf32>
      %c128 = arith.constant 128 : index
      %c0_11 = arith.constant 0 : index
      %13 = vector.load %arg9[%c128, %c0_11] : memref<256x32xf32, #tpu.memory_space<vmem>>, vector<128x32xf32>
      %c0_12 = arith.constant 0 : index
      %c0_13 = arith.constant 0 : index
      %14 = vector.load %arg4[%c0_12, %c0_13] : memref<128x32xf32, #tpu.memory_space<vmem>>, vector<128x32xf32>
      %c0_14 = arith.constant 0 : index
      %c0_15 = arith.constant 0 : index
      %15 = vector.load %arg5[%c0_14, %c0_15] : memref<64x32xf32, #tpu.memory_space<vmem>>, vector<32x32xf32>
      %c32 = arith.constant 32 : index
      %c0_16 = arith.constant 0 : index
      %16 = vector.load %arg5[%c32, %c0_16] : memref<64x32xf32, #tpu.memory_space<vmem>>, vector<32x32xf32>
      %cst_17 = arith.constant dense<0.000000e+00> : vector<128x32xf32>
      %17 = tpu.matmul %12, %15, %cst_17 {dimension_numbers = #tpu.dot_dimension_numbers<[1], [0], [0], [1], [0, 0, 1, 1], [], []>} : vector<128x32xf32>, vector<32x32xf32>, vector<128x32xf32> -> vector<128x32xf32>
      %18 = arith.mulf %13, %14 : vector<128x32xf32>
      %cst_18 = arith.constant dense<0.000000e+00> : vector<128x32xf32>
      %19 = tpu.matmul %18, %16, %cst_18 {dimension_numbers = #tpu.dot_dimension_numbers<[1], [0], [0], [1], [0, 0, 1, 1], [], []>} : vector<128x32xf32>, vector<32x32xf32>, vector<128x32xf32> -> vector<128x32xf32>
      %20 = arith.addf %17, %19 : vector<128x32xf32>
      %c0_19 = arith.constant 0 : index
      %c0_20 = arith.constant 0 : index
      %21 = vector.load %arg6[%c0_19, %c0_20] : memref<1x32xf32, #tpu.memory_space<vmem>>, vector<1x32xf32>
      %22 = vector.broadcast %21 : vector<1x32xf32> to vector<128x32xf32>
      %23 = arith.addf %20, %22 : vector<128x32xf32>
      %cst_21 = arith.constant 0.000000e+00 : f32
      %24 = vector.broadcast %cst_21 : f32 to vector<128x32xf32>
      %25 = arith.cmpf oge, %23, %24 : vector<128x32xf32>
      %cst_22 = arith.constant 2.000000e-01 : f32
      %26 = vector.broadcast %cst_22 : f32 to vector<128x32xf32>
      %27 = arith.mulf %26, %23 : vector<128x32xf32>
      %28 = arith.select %25, %23, %27 : vector<128x32xi1>, vector<128x32xf32>
      %c0_23 = arith.constant 0 : index
      %c0_24 = arith.constant 0 : index
      %29 = vector.load %arg7[%c0_23, %c0_24] : memref<128x32xf32, #tpu.memory_space<vmem>>, vector<128x32xf32>
      tpu.vector_store %arg7[%c0_23, %c0_24], %28 {strides = array<i32>} : memref<128x32xf32, #tpu.memory_space<vmem>>, vector<128x32xf32>,
      %30 = arith.mulf %28, %28 : vector<128x32xf32>
      %cst_25 = arith.constant dense<0.000000e+00> : vector<128xf32>
      %31 = vector.multi_reduction <add>, %30, %cst_25 [1] : vector<128x32xf32> to vector<128xf32>
      %32 = vector.shape_cast %31 : vector<128xf32> to vector<128x1xf32>
      %cst_26 = arith.constant 1.000000e-24 : f32
      %33 = vector.broadcast %cst_26 : f32 to vector<128x1xf32>
      %34 = arith.maximumf %32, %33 : vector<128x1xf32>
      %35 = math.rsqrt %34 : vector<128x1xf32>
      %36 = vector.broadcast %35 : vector<128x1xf32> to vector<128x32xf32>
      %37 = arith.mulf %28, %36 : vector<128x32xf32>
      %c0_27 = arith.constant 0 : index
      %c0_28 = arith.constant 0 : index
      %38 = vector.load %arg8[%c0_27, %c0_28] : memref<128x32xf32, #tpu.memory_space<vmem>>, vector<128x32xf32>
      tpu.vector_store %arg8[%c0_27, %c0_28], %37 {strides = array<i32>} : memref<128x32xf32, #tpu.memory_space<vmem>>, vector<128x32xf32>,
    } else {
    }
    return
  }
  func.func @transform_0(%arg0: i32, %arg1: i32) -> (i32, i32) {
    %c0_i32 = arith.constant 0 : i32
    return %arg0, %arg1 : i32, i32
  }
  func.func @transform_1(%arg0: i32, %arg1: i32) -> (i32, i32) {
    %c0_i32 = arith.constant 0 : i32
    %c0_i32_0 = arith.constant 0 : i32
    return %arg1, %c0_i32 : i32, i32
  }
  func.func @transform_2(%arg0: i32, %arg1: i32) -> (i32, i32) {
    %c0_i32 = arith.constant 0 : i32
    %c0_i32_0 = arith.constant 0 : i32
    return %arg0, %c0_i32 : i32, i32
  }
  func.func @transform_3(%arg0: i32, %arg1: i32) -> (i32, i32) {
    %c0_i32 = arith.constant 0 : i32
    %c0_i32_0 = arith.constant 0 : i32
    %c0_i32_1 = arith.constant 0 : i32
    return %c0_i32, %c0_i32_0 : i32, i32
  }
  func.func @transform_4(%arg0: i32, %arg1: i32) -> (i32, i32) {
    %c0_i32 = arith.constant 0 : i32
    %c0_i32_0 = arith.constant 0 : i32
    %c0_i32_1 = arith.constant 0 : i32
    return %c0_i32, %c0_i32_0 : i32, i32
  }
  func.func @transform_5(%arg0: i32, %arg1: i32) -> (i32, i32) {
    %c0_i32 = arith.constant 0 : i32
    %c0_i32_0 = arith.constant 0 : i32
    return %arg0, %c0_i32 : i32, i32
  }
  func.func @transform_6(%arg0: i32, %arg1: i32) -> (i32, i32) {
    %c0_i32 = arith.constant 0 : i32
    %c0_i32_0 = arith.constant 0 : i32
    return %arg0, %c0_i32 : i32, i32
  }
}

</mosaic_0001>

<bundles_post_ra>
// kernel: tpu_custom_call.1
= control target key start
LH: loop header
LB: loop body
LE: loop exit
PB: predicated region body
PF: predicated region fallthrough
CT: control target
= control target key end

     0   :  { %s2302_s21 = smov 0   ;;  %s2304_s22 = smov 0   ;;  %s2837_s0 = inlined_call_operand.vmem [shape: bf16[512,256], index: 0, kind: input, shape index: {}]   ;;  %s2838_s1 = inlined_call_operand.vmem [shape: bf16[256,32], index: 1, kind: input, shape index: {}]   ;;  %s2839_s2 = inlined_call_operand.vmem [shape: f32[256,32], index: 2, kind: input, shape index: {}]   ;;  %s2840_s3 = inlined_call_operand.vmem [shape: f32[64,32], index: 3, kind: input, shape index: {}]   ;;  %s2841_s4 = inlined_call_operand.vmem [shape: f32[1,32], index: 4, kind: input, shape index: {}]   ;;  %s2842_s5 = inlined_call_operand.vmem [shape: f32[256,32], index: 5, kind: output, shape index: {0}]   ;;  %s2843_s6 = inlined_call_operand.vmem [shape: f32[256,32], index: 6, kind: output, shape index: {1}]  }
   0x1   :  { %s2306_s23 = smov 0   ;;  %s2308_s24 = smov 0  }
   0x2   :  { %s2310_s25 = smov 0   ;;  %s2312_s26 = smov 0  }
   0x3   :  { %s2314_s27 = smov 0  }
   0x4 LB: > { %s26_s28 = sadd.s32 1, %s2256_s25  ;;  %s29_s29 = sadd.s32 1, %s2260_s26  ;;  %s2264_s27 = sphi %s2314_s27, %s17_s27   ;;  %s2260_s26 = sphi %s2312_s26, %s2849_s26   ;;  %s2256_s25 = sphi %s2310_s25, %s2848_s25   ;;  %s2252_s24 = sphi %s2308_s24, %s2847_s24   ;;  %s2248_s23 = sphi %s2306_s23, %s2846_s23   ;;  %s2244_s22 = sphi %s2304_s22, %s2845_s22   ;;  %s2240_s21 = sphi %s2302_s21, %s2844_s21  }
   0x5   : > { %p27_p0 = scmp.ge.s32.totalorder %s26_s28, 2  ;;  %p45_p1 = scmp.ne.s32.totalorder %s2244_s22, %s2240_s21 }
   0x6   : > { %p46_p2 = scmp.eq.s32.totalorder %s2264_s27, 0  ;;  %s38_s9 = sadd.s32 1, %s2244_s22 }
   0x7   : > { %s2851_s28 = smov (%p27_p0, %s26_s28), 0  ;;  %s2853_s29 = smov (!%p27_p0, %s29_s29), %s2260_s26 }
   0x8   : > { %p47_p3 = por %p46_p2, %p45_p1  ;;  %p31_p4 = scmp.ge.s32.totalorder %s2853_s29, 2 }
   0x9   : > { %s34_s30 = ssub.s32 %s2256_s25, %s2851_s28  ;;  %p1796_p6 = scmp.ge.s32.totalorder %s2264_s27, 4 }
   0xa   : > { %s2855_s29 = smov (%p31_p4, %s2853_s29), 0 }
   0xb   : > { %s33_s7 = ssub.s32 %s2260_s26, %s2855_s29  ;;  %223 = sbr.rel (%p1796_p6) target bundleno = 45 (0x2d), region = 24 }
   0xc   : > { %s35_s8 = sor.u32 %s34_s30, %s33_s7 }
   0xd   : > { %p36_p5 = scmp.eq.s32.totalorder %s35_s8, 0 }
   0xf   : > { %s2353_s10 = scalar_select %p36_p5, %s2244_s22, %s38_s9  }
  0x12   : > { %226 = sbr.rel (!%p47_p3) target bundleno = 45 (0x2d), region = 28  ;;  %s228_s11 = sand.u32 (%p47_p3), 1, %s2244_s22  }
  0x13   : > { %s1872_s12 = sshll.u32 (%p47_p3), %s2260_s26, 6  ;;  %s1797_s13 = sshll.u32 (%p47_p3), %s228_s11, 7 }
  0x14   : > { %s233_s14 = sadd.s32 (%p47_p3), %s2256_s25, %s1872_s12  ;;  %s2367_s19 = scalar_lea.vmem (%p47_p3), [#allocation3], %s1797_s13 }
  0x15   : > { %s1800_s15 = sshll.u32 (%p47_p3), %s233_s14, 2 }
  0x16   : > { %s2362_s18 = scalar_lea.vmem (%p47_p3), %s2837_s0, %s1800_s15 }
  0x17   : > { %v251_v0 = vld [vmem:[%s2362_s18] sm:$0xf] (%p47_p3)  ;;  %v253_v1 = vld [vmem:[%s2362_s18 + $0x8] sm:$0xf] (%p47_p3)  ;;  %v255_v2 = vld [vmem:[%s2362_s18 + $0x10] sm:$0xf] (%p47_p3) }
  0x18   : > { %252 = vst [vmem:[%s2367_s19] sm:$0xf] (%p47_p3), %v251_v0  ;;  %254 = vst [vmem:[%s2367_s19 + $0x4] sm:$0xf] (%p47_p3), %v253_v1  ;;  %v257_v3 = vld [vmem:[%s2362_s18 + $0x18] sm:$0xf] (%p47_p3) }
  0x19   : > { %256 = vst [vmem:[%s2367_s19 + $0x8] sm:$0xf] %v255_v2  ;;  %v259_v4 = vld [vmem:[%s2362_s18 + $0x20] sm:$0xf]  ;;  %v261_v5 = vld [vmem:[%s2362_s18 + $0x28] sm:$0xf] }
  0x1a   : > { %258 = vst [vmem:[%s2367_s19 + $0xc] sm:$0xf] %v257_v3  ;;  %260 = vst [vmem:[%s2367_s19 + $0x10] sm:$0xf] %v259_v4  ;;  %v263_v6 = vld [vmem:[%s2362_s18 + $0x30] sm:$0xf] }
  0x1b   : > { %262 = vst [vmem:[%s2367_s19 + $0x14] sm:$0xf] %v261_v5  ;;  %v265_v7 = vld [vmem:[%s2362_s18 + $0x38] sm:$0xf]  ;;  %v267_v8 = vld [vmem:[%s2362_s18 + $0x40] sm:$0xf] }
  0x1c   : > { %264 = vst [vmem:[%s2367_s19 + $0x18] sm:$0xf] %v263_v6  ;;  %266 = vst [vmem:[%s2367_s19 + $0x1c] sm:$0xf] %v265_v7  ;;  %v269_v9 = vld [vmem:[%s2362_s18 + $0x48] sm:$0xf] }
  0x1d   : > { %268 = vst [vmem:[%s2367_s19 + $0x20] sm:$0xf] %v267_v8  ;;  %v271_v10 = vld [vmem:[%s2362_s18 + $0x50] sm:$0xf]  ;;  %v273_v11 = vld [vmem:[%s2362_s18 + $0x58] sm:$0xf] }
  0x1e   : > { %270 = vst [vmem:[%s2367_s19 + $0x24] sm:$0xf] %v269_v9  ;;  %272 = vst [vmem:[%s2367_s19 + $0x28] sm:$0xf] %v271_v10  ;;  %v275_v12 = vld [vmem:[%s2362_s18 + $0x60] sm:$0xf] }
  0x1f   : > { %274 = vst [vmem:[%s2367_s19 + $0x2c] sm:$0xf] %v273_v11  ;;  %v277_v13 = vld [vmem:[%s2362_s18 + $0x68] sm:$0xf]  ;;  %v279_v14 = vld [vmem:[%s2362_s18 + $0x70] sm:$0xf] }
  0x20   : > { %276 = vst [vmem:[%s2367_s19 + $0x30] sm:$0xf] %v275_v12  ;;  %278 = vst [vmem:[%s2367_s19 + $0x34] sm:$0xf] %v277_v13  ;;  %v281_v15 = vld [vmem:[%s2362_s18 + $0x78] sm:$0xf] }
  0x21   : > { %280 = vst [vmem:[%s2367_s19 + $0x38] sm:$0xf] %v279_v14  ;;  %v283_v16 = vld [vmem:[%s2362_s18 + $0x80] sm:$0xf]  ;;  %v285_v17 = vld [vmem:[%s2362_s18 + $0x88] sm:$0xf] }
  0x22   : > { %282 = vst [vmem:[%s2367_s19 + $0x3c] sm:$0xf] %v281_v15  ;;  %284 = vst [vmem:[%s2367_s19 + $0x40] sm:$0xf] %v283_v16  ;;  %v287_v18 = vld [vmem:[%s2362_s18 + $0x90] sm:$0xf] }
  0x23   : > { %286 = vst [vmem:[%s2367_s19 + $0x44] sm:$0xf] %v285_v17  ;;  %v289_v19 = vld [vmem:[%s2362_s18 + $0x98] sm:$0xf]  ;;  %v291_v20 = vld [vmem:[%s2362_s18 + $0xa0] sm:$0xf] }
  0x24   : > { %288 = vst [vmem:[%s2367_s19 + $0x48] sm:$0xf] %v287_v18  ;;  %290 = vst [vmem:[%s2367_s19 + $0x4c] sm:$0xf] %v289_v19  ;;  %v293_v21 = vld [vmem:[%s2362_s18 + $0xa8] sm:$0xf] }
  0x25   : > { %292 = vst [vmem:[%s2367_s19 + $0x50] sm:$0xf] %v291_v20  ;;  %v295_v22 = vld [vmem:[%s2362_s18 + $0xb0] sm:$0xf]  ;;  %v297_v23 = vld [vmem:[%s2362_s18 + $0xb8] sm:$0xf] }
  0x26   : > { %294 = vst [vmem:[%s2367_s19 + $0x54] sm:$0xf] %v293_v21  ;;  %296 = vst [vmem:[%s2367_s19 + $0x58] sm:$0xf] %v295_v22  ;;  %v299_v24 = vld [vmem:[%s2362_s18 + $0xc0] sm:$0xf] }
  0x27   : > { %298 = vst [vmem:[%s2367_s19 + $0x5c] sm:$0xf] %v297_v23  ;;  %v301_v25 = vld [vmem:[%s2362_s18 + $0xc8] sm:$0xf]  ;;  %v303_v26 = vld [vmem:[%s2362_s18 + $0xd0] sm:$0xf] }
  0x28   : > { %300 = vst [vmem:[%s2367_s19 + $0x60] sm:$0xf] %v299_v24  ;;  %302 = vst [vmem:[%s2367_s19 + $0x64] sm:$0xf] %v301_v25  ;;  %v305_v27 = vld [vmem:[%s2362_s18 + $0xd8] sm:$0xf] }
  0x29   : > { %304 = vst [vmem:[%s2367_s19 + $0x68] sm:$0xf] %v303_v26  ;;  %v307_v28 = vld [vmem:[%s2362_s18 + $0xe0] sm:$0xf]  ;;  %v309_v29 = vld [vmem:[%s2362_s18 + $0xe8] sm:$0xf] }
  0x2a   : > { %306 = vst [vmem:[%s2367_s19 + $0x6c] sm:$0xf] %v305_v27  ;;  %308 = vst [vmem:[%s2367_s19 + $0x70] sm:$0xf] %v307_v28  ;;  %v311_v30 = vld [vmem:[%s2362_s18 + $0xf0] sm:$0xf] }
  0x2b   : > { %310 = vst [vmem:[%s2367_s19 + $0x74] sm:$0xf] %v309_v29  ;;  %v313_v31 = vld [vmem:[%s2362_s18 + $0xf8] sm:$0xf]  ;;  %312 = vst [vmem:[%s2367_s19 + $0x78] sm:$0xf] %v311_v30 }
  0x2c   : > { %314 = vst [vmem:[%s2367_s19 + $0x7c] sm:$0xf] %v313_v31 }
  0x2d PF: > { %p1801_p7 = scmp.ge.s32.totalorder %s2264_s27, 1  ;;  %p418_p8 = scmp.lt.s32.totalorder %s2264_s27, 5 }
  0x2f   : > { %p419_p9 = pnand %p1801_p7, %p418_p8 }
  0x30   : > { %s425_s20 = sand.u32 (!%p419_p9), 1, %s2240_s21   ;;  %s1803_s30 = sshll.u32 (!%p419_p9), %s2248_s23, 4 }
  0x31   : > { %422 = sbr.rel (%p419_p9) target bundleno = 753 (0x2f1), region = 77  ;;  %s1802_s7 = sshll.u32 (!%p419_p9), %s425_s20, 7 }
  0x32   : > { %p471_p10 = scmp.lt.s32.totalorder (!%p419_p9), %s1803_s30, 31  ;;  %s1805_s8 = sshll.u32 (!%p419_p9), %s2252_s24, 4 }
  0x33   : > { %p477_p11 = scmp.lt.s32.totalorder (!%p419_p9), %s1805_s8, 31  ;;  %s2455_s11 = scalar_lea.vmem (!%p419_p9), [#allocation3], %s1802_s7 }
  0x34   : > { %p1811_p12 = scmp.ne.s32.totalorder (!%p419_p9), %s2248_s23, 0 }
  0x38   : > { %s2857_s30 = smov (!%p471_p10, %s1803_s30), 31  ;;  %s2859_s8 = smov (!%p477_p11, %s1805_s8), 31 }
  0x39   : > { %s1804_s9 = sshll.u32 %s2857_s30, 2  ;;  %s1806_s14 = sshll.u32 %s2859_s8, 3  ;;  %vm499_vm0 = vcmask (!%p1811_p12), 261120   ;;  %v2266_v32 = vmov (!%p1811_p12), 0.0  }
  0x3a   : > { %s2438_s13 = scalar_lea.vmem %s2838_s1, %s1804_s9  ;;  %s2443_s17 = scalar_lea.vmem %s2839_s2, %s1806_s14  ;;  %500 = vst.msk [vmem:[#allocation2] sm:$0xff] (!%p1811_p12), %vm499_vm0, %v2266_v32  ;;  %501 = vst.msk [vmem:[#allocation2 + $0x8] sm:$0xff] (!%p1811_p12), %vm499_vm0, %v2266_v32 }
  0x3b   : > { %s2448_s19 = scalar_lea.vmem %s2842_s5, %s1806_s14  ;;  %s2453_s30 = scalar_lea.vmem %s2843_s6, %s1806_s14  ;;  %502 = vst.msk [vmem:[#allocation2 + $0x10] sm:$0xff] (!%p1811_p12), %vm499_vm0, %v2266_v32  ;;  %503 = vst.msk [vmem:[#allocation2 + $0x18] sm:$0xff] (!%p1811_p12), %vm499_vm0, %v2266_v32 }
  0x3c   : > { %498 = sbr.rel (%p1811_p12) target bundleno = 74 (0x4a), region = 85  ;;  %504 = vst.msk [vmem:[#allocation2 + $0x20] sm:$0xff] (!%p1811_p12), %vm499_vm0, %v2266_v32  ;;  %505 = vst.msk [vmem:[#allocation2 + $0x28] sm:$0xff] (!%p1811_p12), %vm499_vm0, %v2266_v32 }
  0x3d   : > { %506 = vst.msk [vmem:[#allocation2 + $0x30] sm:$0xff] (!%p1811_p12), %vm499_vm0, %v2266_v32  ;;  %507 = vst.msk [vmem:[#allocation2 + $0x38] sm:$0xff] (!%p1811_p12), %vm499_vm0, %v2266_v32 }
  0x3e   : > { %508 = vst.msk [vmem:[#allocation2 + $0x40] sm:$0xff] (!%p1811_p12), %vm499_vm0, %v2266_v32  ;;  %509 = vst.msk [vmem:[#allocation2 + $0x48] sm:$0xff] (!%p1811_p12), %vm499_vm0, %v2266_v32 }
  0x3f   : > { %510 = vst.msk [vmem:[#allocation2 + $0x50] sm:$0xff] (!%p1811_p12), %vm499_vm0, %v2266_v32  ;;  %511 = vst.msk [vmem:[#allocation2 + $0x58] sm:$0xff] (!%p1811_p12), %vm499_vm0, %v2266_v32 }
  0x40   : > { %512 = vst.msk [vmem:[#allocation2 + $0x60] sm:$0xff] (!%p1811_p12), %vm499_vm0, %v2266_v32  ;;  %513 = vst.msk [vmem:[#allocation2 + $0x68] sm:$0xff] (!%p1811_p12), %vm499_vm0, %v2266_v32 }
  0x41   : > { %514 = vst.msk [vmem:[#allocation2 + $0x70] sm:$0xff] (!%p1811_p12), %vm499_vm0, %v2266_v32  ;;  %515 = vst.msk [vmem:[#allocation2 + $0x78] sm:$0xff] (!%p1811_p12), %vm499_vm0, %v2266_v32 }
  0x42   : > { %516 = vst.msk [vmem:[#allocation2 + $0x80] sm:$0xff] (!%p1811_p12), %vm499_vm0, %v2266_v32  ;;  %517 = vst.msk [vmem:[#allocation2 + $0x88] sm:$0xff] (!%p1811_p12), %vm499_vm0, %v2266_v32 }
  0x43   : > { %518 = vst.msk [vmem:[#allocation2 + $0x90] sm:$0xff] %vm499_vm0, %v2266_v32  ;;  %519 = vst.msk [vmem:[#allocation2 + $0x98] sm:$0xff] %vm499_vm0, %v2266_v32 }
  0x44   : > { %520 = vst.msk [vmem:[#allocation2 + $0xa0] sm:$0xff] %vm499_vm0, %v2266_v32  ;;  %521 = vst.msk [vmem:[#allocation2 + $0xa8] sm:$0xff] %vm499_vm0, %v2266_v32 }
  0x45   : > { %522 = vst.msk [vmem:[#allocation2 + $0xb0] sm:$0xff] %vm499_vm0, %v2266_v32  ;;  %523 = vst.msk [vmem:[#allocation2 + $0xb8] sm:$0xff] %vm499_vm0, %v2266_v32 }
  0x46   : > { %524 = vst.msk [vmem:[#allocation2 + $0xc0] sm:$0xff] %vm499_vm0, %v2266_v32  ;;  %525 = vst.msk [vmem:[#allocation2 + $0xc8] sm:$0xff] %vm499_vm0, %v2266_v32 }
  0x47   : > { %526 = vst.msk [vmem:[#allocation2 + $0xd0] sm:$0xff] %vm499_vm0, %v2266_v32  ;;  %527 = vst.msk [vmem:[#allocation2 + $0xd8] sm:$0xff] %vm499_vm0, %v2266_v32 }
  0x48   : > { %528 = vst.msk [vmem:[#allocation2 + $0xe0] sm:$0xff] %vm499_vm0, %v2266_v32  ;;  %529 = vst.msk [vmem:[#allocation2 + $0xe8] sm:$0xff] %vm499_vm0, %v2266_v32 }
  0x49   : > { %530 = vst.msk [vmem:[#allocation2 + $0xf0] sm:$0xff] %vm499_vm0, %v2266_v32  ;;  %531 = vst.msk [vmem:[#allocation2 + $0xf8] sm:$0xff] %vm499_vm0, %v2266_v32 }
  0x4a PF: > { %v2154_v33 = vld [vmem:[%s2438_s13] sm:$0xff]   ;;  %v2155_v34 = vld [vmem:[%s2438_s13 + $0x8] sm:$0xff]   ;;  %v2156_v35 = vld [vmem:[%s2438_s13 + $0x10] sm:$0xff]   ;;  %vm949_vm1 = vcmask 261120   ;;  %p1836_p13 = scmp.ne.s32.totalorder %s2248_s23, 1 }
  0x4b   : > { %1937 = vmatprep.subr.bf16.mxu0 %v2154_v33  ;;  %2065 = vmatprep.subr.bf16.mxu1 %v2154_v33  ;;  %v2157_v36 = vld [vmem:[%s2438_s13 + $0x18] sm:$0xff]   ;;  %v2162_v37 = vld [vmem:[%s2455_s11] sm:$0xff]   ;;  %v2159_v40 = vld [vmem:[%s2438_s13 + $0x28] sm:$0xff]  }
  0x4c   : > { %1938 = vmatpush3.bf16.msra.mxu0 %v2154_v33  ;;  %2073 = vmatpush3.bf16.msra.mxu1 %v2154_v33  ;;  %v2163_v38 = vld [vmem:[%s2455_s11 + $0x40] sm:$0xff]   ;;  %v2160_v41 = vld [vmem:[%s2438_s13 + $0x30] sm:$0xff]   ;;  %v2161_v42 = vld [vmem:[%s2438_s13 + $0x38] sm:$0xff]  }
  0x4d   : > { %1939 = vmatprep.subr.bf16.mxu0 %v2155_v34  ;;  %2066 = vmatprep.subr.bf16.mxu1 %v2155_v34  ;;  %v2158_v39 = vld [vmem:[%s2438_s13 + $0x20] sm:$0xff]   ;;  %v2164_v43 = vld [vmem:[%s2455_s11 + $0x8] sm:$0xff]   ;;  %v2166_v45 = vld [vmem:[%s2455_s11 + $0x10] sm:$0xff]  }
  0x4e   : > { %1953 = vmatprep.mubr.bf16.mxu0 %v2162_v37  ;;  %1969 = vmatprep.mubr.bf16.mxu1 %v2163_v38  ;;  %v2165_v44 = vld [vmem:[%s2455_s11 + $0x48] sm:$0xff]   ;;  %v2167_v46 = vld [vmem:[%s2455_s11 + $0x50] sm:$0xff]   ;;  %v2168_v47 = vld [vmem:[%s2455_s11 + $0x18] sm:$0xff]  }
  0x4f   : > { %v2169_v48 = vld [vmem:[%s2455_s11 + $0x58] sm:$0xff]   ;;  %v2170_v49 = vld [vmem:[%s2455_s11 + $0x20] sm:$0xff]   ;;  %v2172_v51 = vld [vmem:[%s2455_s11 + $0x28] sm:$0xff]  }
  0x50   : > { %1940 = vmatpush3.bf16.msra.mxu0 %v2155_v34  ;;  %2074 = vmatpush3.bf16.msra.mxu1 %v2155_v34  ;;  %v2171_v50 = vld [vmem:[%s2455_s11 + $0x60] sm:$0xff]   ;;  %v2173_v52 = vld [vmem:[%s2455_s11 + $0x68] sm:$0xff]   ;;  %v2174_v53 = vld [vmem:[%s2455_s11 + $0x30] sm:$0xff]  }
  0x51   : > { %1941 = vmatprep.subr.bf16.mxu0 %v2156_v35  ;;  %2067 = vmatprep.subr.bf16.mxu1 %v2156_v35  ;;  %v2175_v54 = vld [vmem:[%s2455_s11 + $0x70] sm:$0xff]   ;;  %v2176_v55 = vld [vmem:[%s2455_s11 + $0x38] sm:$0xff]   ;;  %v532_v59 = vld [vmem:[#allocation2] sm:$0xff] }
  0x52   : > { %v2177_v56 = vld [vmem:[%s2455_s11 + $0x78] sm:$0xff]   ;;  %v534_v57 = vld [vmem:[#allocation2 + $0x10] sm:$0xff]  ;;  %v548_v60 = vld [vmem:[#allocation2 + $0x80] sm:$0xff] }
  0x53   : > { %v550_v58 = vld [vmem:[#allocation2 + $0x90] sm:$0xff]  ;;  %v535_v63 = vld [vmem:[#allocation2 + $0x18] sm:$0xff]  ;;  %v533_v5 = vld [vmem:[#allocation2 + $0x8] sm:$0xff] }
  0x54   : > { %1942 = vmatpush3.bf16.msra.mxu0 %v2156_v35  ;;  %2075 = vmatpush3.bf16.msra.mxu1 %v2156_v35  ;;  %v551_v0 = vld [vmem:[#allocation2 + $0x98] sm:$0xff]  ;;  %v549_v6 = vld [vmem:[#allocation2 + $0x88] sm:$0xff]  ;;  %v538_v17 = vld [vmem:[#allocation2 + $0x30] sm:$0xff] }
  0x55   : > { %1943 = vmatprep.subr.bf16.mxu0 %v2157_v36  ;;  %2068 = vmatprep.subr.bf16.mxu1 %v2157_v36  ;;  %v554_v18 = vld [vmem:[#allocation2 + $0xb0] sm:$0xff]  ;;  %v536_v19 = vld [vmem:[#allocation2 + $0x20] sm:$0xff]  ;;  %v539_v23 = vld [vmem:[#allocation2 + $0x38] sm:$0xff] }
  0x56   : > { %v552_v20 = vld [vmem:[#allocation2 + $0xa0] sm:$0xff]  ;;  %v555_v24 = vld [vmem:[#allocation2 + $0xb8] sm:$0xff]  ;;  %v537_v29 = vld [vmem:[#allocation2 + $0x28] sm:$0xff] }
  0x57   : > { %v553_v30 = vld [vmem:[#allocation2 + $0xa8] sm:$0xff] }
  0x58   : > { %1944 = vmatpush3.bf16.msra.mxu0 %v2157_v36  ;;  %2076 = vmatpush3.bf16.msra.mxu1 %v2157_v36 }
  0x59   : > { %1945 = vmatprep.subr.bf16.mxu0 %v2158_v39  ;;  %2069 = vmatprep.subr.bf16.mxu1 %v2158_v39 }
  0x5c   : > { %1946 = vmatpush3.bf16.msra.mxu0 %v2158_v39  ;;  %2077 = vmatpush3.bf16.msra.mxu1 %v2158_v39 }
  0x5d   : > { %1947 = vmatprep.subr.bf16.mxu0 %v2159_v40  ;;  %2070 = vmatprep.subr.bf16.mxu1 %v2159_v40 }
  0x60   : > { %1948 = vmatpush3.bf16.msra.mxu0 %v2159_v40  ;;  %2078 = vmatpush3.bf16.msra.mxu1 %v2159_v40 }
  0x61   : > { %1949 = vmatprep.subr.bf16.mxu0 %v2160_v41  ;;  %2071 = vmatprep.subr.bf16.mxu1 %v2160_v41 }
  0x64   : > { %1950 = vmatpush3.bf16.msra.mxu0 %v2160_v41  ;;  %2079 = vmatpush3.bf16.msra.mxu1 %v2160_v41  ;;  %v542_v41 = vld [vmem:[#allocation2 + $0x50] sm:$0xff] }
  0x65   : > { %1951 = vmatprep.subr.bf16.mxu0 %v2161_v42  ;;  %2072 = vmatprep.subr.bf16.mxu1 %v2161_v42 }
  0x68   : > { %1952 = vmatpush3.bf16.msra.mxu0 %v2161_v42  ;;  %2080 = vmatpush3.bf16.msra.mxu1 %v2161_v42  ;;  %v558_v42 = vld [vmem:[#allocation2 + $0xd0] sm:$0xff] }
  0x6b   : > { %1954 = vmatmul.mubr.bf16.vlgmr.msra.gmra.mrb[0].mxu0 %v2164_v43  ;;  %1970 = vmatmul.mubr.bf16.vlgmr.msra.gmra.mrb[0].mxu1 %v2165_v44  ;;  %v540_v43 = vld [vmem:[#allocation2 + $0x40] sm:$0xff] }
  0x6c   : > { %1957 = vmatprep.mubr.bf16.mxu0 %v2166_v45  ;;  %1973 = vmatprep.mubr.bf16.mxu1 %v2167_v46  ;;  %v556_v44 = vld [vmem:[#allocation2 + $0xc0] sm:$0xff] }
  0x73   : > { %1958 = vmatmul.mubr.bf16.gmra.mrb[4].mxu0 %v2168_v47  ;;  %1974 = vmatmul.mubr.bf16.gmra.mrb[4].mxu1 %v2169_v48  ;;  %v543_v47 = vld [vmem:[#allocation2 + $0x58] sm:$0xff] }
  0x74   : > { %1961 = vmatprep.mubr.bf16.mxu0 %v2170_v49  ;;  %1977 = vmatprep.mubr.bf16.mxu1 %v2171_v50  ;;  %v559_v48 = vld [vmem:[#allocation2 + $0xd8] sm:$0xff] }
  0x7b   : > { %1962 = vmatmul.mubr.bf16.gmra.mrb[8].mxu0 %v2172_v51  ;;  %1978 = vmatmul.mubr.bf16.gmra.mrb[8].mxu1 %v2173_v52 }
  0x7c   : > { %1965 = vmatprep.mubr.bf16.mxu0 %v2174_v53  ;;  %1981 = vmatprep.mubr.bf16.mxu1 %v2175_v54  ;;  %v541_v53 = vld [vmem:[#allocation2 + $0x48] sm:$0xff] }
  0x7d   : > { %v557_v54 = vld [vmem:[#allocation2 + $0xc8] sm:$0xff] }
  0x83   : > { %1966 = vmatmul.mubr.bf16.gmra.mrb[12].mxu0 %v2176_v55  ;;  %1982 = vmatmul.mubr.bf16.gmra.mrb[12].mxu1 %v2177_v56 }
 0x13e   : > { %v1955_v61 = vpop.f32.mrb[0].mxu0  ;;  %v1971_v62 = vpop.f32.mrb[0].mxu1 }
 0x13f   : > { %v919_v1 = vadd.f32 %v1955_v61, %v534_v57  ;;  %v935_v2 = vadd.f32 %v1971_v62, %v550_v58  ;;  %v790_v3 = vpop.f32.mrb[1].mxu0  ;;  %v854_v4 = vpop.f32.mrb[1].mxu1 }
 0x140   : > { %v917_v7 = vadd.f32 %v790_v3, %v532_v59  ;;  %v933_v8 = vadd.f32 %v854_v4, %v548_v60  ;;  %v1956_v9 = vpop.f32.mrb[2].mxu0  ;;  %v1972_v10 = vpop.f32.mrb[2].mxu1  ;;  %v544_v3 = vld [vmem:[#allocation2 + $0x60] sm:$0xff] }
 0x141   : > { %952 = vst.msk [vmem:[#allocation2 + $0x10] sm:$0xff] %vm949_vm1, %v919_v1  ;;  %968 = vst.msk [vmem:[#allocation2 + $0x90] sm:$0xff] %vm949_vm1, %v935_v2  ;;  %v920_v11 = vadd.f32 %v1956_v9, %v535_v63  ;;  %v936_v12 = vadd.f32 %v1972_v10, %v551_v0  ;;  %v793_v13 = vpop.f32.mrb[3].mxu0  ;;  %v857_v14 = vpop.f32.mrb[3].mxu1  ;;  %v546_v1 = vld [vmem:[#allocation2 + $0x70] sm:$0xff]  ;;  %v560_v4 = vld [vmem:[#allocation2 + $0xe0] sm:$0xff] }
 0x142   : > { %950 = vst.msk [vmem:[#allocation2] sm:$0xff] %vm949_vm1, %v917_v7  ;;  %966 = vst.msk [vmem:[#allocation2 + $0x80] sm:$0xff] %vm949_vm1, %v933_v8  ;;  %v918_v15 = vadd.f32 %v793_v13, %v533_v5  ;;  %v934_v16 = vadd.f32 %v857_v14, %v549_v6  ;;  %v562_v2 = vld [vmem:[#allocation2 + $0xf0] sm:$0xff]  ;;  %v547_v7 = vld [vmem:[#allocation2 + $0x78] sm:$0xff] }
 0x143   : > { %953 = vst.msk [vmem:[#allocation2 + $0x18] sm:$0xff] %vm949_vm1, %v920_v11  ;;  %969 = vst.msk [vmem:[#allocation2 + $0x98] sm:$0xff] %vm949_vm1, %v936_v12  ;;  %v563_v8 = vld [vmem:[#allocation2 + $0xf8] sm:$0xff]  ;;  %v545_v13 = vld [vmem:[#allocation2 + $0x68] sm:$0xff] }
 0x144   : > { %951 = vst.msk [vmem:[#allocation2 + $0x8] sm:$0xff] %vm949_vm1, %v918_v15  ;;  %967 = vst.msk [vmem:[#allocation2 + $0x88] sm:$0xff] %vm949_vm1, %v934_v16  ;;  %v561_v14 = vld [vmem:[#allocation2 + $0xe8] sm:$0xff] }
 0x146   : > { %v1959_v21 = vpop.f32.mrb[4].mxu0  ;;  %v1975_v22 = vpop.f32.mrb[4].mxu1 }
 0x147   : > { %v923_v25 = vadd.f32 %v1959_v21, %v538_v17  ;;  %v939_v26 = vadd.f32 %v1975_v22, %v554_v18  ;;  %v806_v27 = vpop.f32.mrb[5].mxu0  ;;  %v870_v28 = vpop.f32.mrb[5].mxu1 }
 0x148   : > { %v921_v31 = vadd.f32 %v806_v27, %v536_v19  ;;  %v937_v32 = vadd.f32 %v870_v28, %v552_v20  ;;  %v1960_v33 = vpop.f32.mrb[6].mxu0  ;;  %v1976_v34 = vpop.f32.mrb[6].mxu1  ;;  %v1034_v27 = vld [vmem:[%s2840_s3] sm:$0xff] (!%p1836_p13) }
 0x149   : > { %956 = vst.msk [vmem:[#allocation2 + $0x30] sm:$0xff] %vm949_vm1, %v923_v25  ;;  %972 = vst.msk [vmem:[#allocation2 + $0xb0] sm:$0xff] %vm949_vm1, %v939_v26  ;;  %v924_v35 = vadd.f32 %v1960_v33, %v539_v23  ;;  %v940_v36 = vadd.f32 %v1976_v34, %v555_v24  ;;  %v809_v37 = vpop.f32.mrb[7].mxu0  ;;  %v873_v38 = vpop.f32.mrb[7].mxu1  ;;  %v1038_v25 = vld [vmem:[%s2840_s3 + $0x20] sm:$0xff] (!%p1836_p13)  ;;  %v1039_v26 = vld [vmem:[%s2840_s3 + $0x28] sm:$0xff] (!%p1836_p13) }
 0x14a   : > { %954 = vst.msk [vmem:[#allocation2 + $0x20] sm:$0xff] %vm949_vm1, %v921_v31  ;;  %970 = vst.msk [vmem:[#allocation2 + $0xa0] sm:$0xff] %vm949_vm1, %v937_v32  ;;  %v922_v39 = vadd.f32 %v809_v37, %v537_v29  ;;  %v938_v40 = vadd.f32 %v873_v38, %v553_v30  ;;  %v2049_v28 = vpack.c.bf16 (!%p1836_p13), %v1039_v26, %v1038_v25  ;;  %v1035_v29 = vld [vmem:[%s2840_s3 + $0x8] sm:$0xff] (!%p1836_p13)  ;;  %v1040_v30 = vld [vmem:[%s2840_s3 + $0x30] sm:$0xff] (!%p1836_p13) }
 0x14b   : > { %957 = vst.msk [vmem:[#allocation2 + $0x38] sm:$0xff] %vm949_vm1, %v924_v35  ;;  %973 = vst.msk [vmem:[#allocation2 + $0xb8] sm:$0xff] %vm949_vm1, %v940_v36  ;;  %v1041_v31 = vld [vmem:[%s2840_s3 + $0x38] sm:$0xff] (!%p1836_p13)  ;;  %v2057_v32 = vpack.c.bf16 (!%p1836_p13), %v1035_v29, %v1034_v27  ;;  %v1036_v34 = vld [vmem:[%s2840_s3 + $0x10] sm:$0xff] (!%p1836_p13) }
 0x14c   : > { %955 = vst.msk [vmem:[#allocation2 + $0x28] sm:$0xff] %vm949_vm1, %v922_v39  ;;  %971 = vst.msk [vmem:[#allocation2 + $0xa8] sm:$0xff] %vm949_vm1, %v938_v40  ;;  %v2053_v33 = vpack.c.bf16 (!%p1836_p13), %v1041_v31, %v1040_v30  ;;  %v1037_v35 = vld [vmem:[%s2840_s3 + $0x18] sm:$0xff] (!%p1836_p13)  ;;  %v1002_v36 = vld [vmem:[#allocation2 + $0x80] sm:$0xff] (!%p1836_p13)  ;;  %2050 = vmatprep.subr.bf16.mxu1 (!%p1836_p13), %v2049_v28 }
 0x14d   : > { %v2061_v37 = vpack.c.bf16 (!%p1836_p13), %v1037_v35, %v1036_v34  ;;  %v1018_v38 = vld [vmem:[%s2443_s17] sm:$0xff] (!%p1836_p13)  ;;  %2058 = vmatprep.subr.bf16.mxu0 (!%p1836_p13), %v2057_v32  ;;  %2052 = vmatpush3.bf16.msra.mxu1 (!%p1836_p13), %v2049_v28  ;;  %v1032_v27 = vld [vmem:[%s2443_s17 + $0x70] sm:$0xff] (!%p1836_p13) }
 0x14e   : > { %v1963_v45 = vpop.f32.mrb[8].mxu0  ;;  %v1979_v46 = vpop.f32.mrb[8].mxu1  ;;  %v1042_v39 = vmul.f32 (!%p1836_p13), %v1018_v38, %v1002_v36  ;;  %v986_v40 = vld [vmem:[#allocation2] sm:$0xff] (!%p1836_p13)  ;;  %2060 = vmatpush3.bf16.msra.mxu0 (!%p1836_p13), %v2057_v32  ;;  %2054 = vmatprep.subr.bf16.mxu1 (!%p1836_p13), %v2053_v33  ;;  %v1033_v32 = vld [vmem:[%s2443_s17 + $0x78] sm:$0xff] (!%p1836_p13) }
 0x14f   : > { %v927_v49 = vadd.f32 %v1963_v45, %v542_v41  ;;  %v943_v50 = vadd.f32 %v1979_v46, %v558_v42  ;;  %v822_v51 = vpop.f32.mrb[9].mxu0  ;;  %v886_v52 = vpop.f32.mrb[9].mxu1  ;;  %v1003_v41 = vld [vmem:[#allocation2 + $0x88] sm:$0xff] (!%p1836_p13)  ;;  %2062 = vmatprep.subr.bf16.mxu0 (!%p1836_p13), %v2061_v37  ;;  %2025 = vmatprep.mubr.msk.f32.mxu0 (!%p1836_p13), %vm949_vm1, %v986_v40 }
 0x150   : > { %v925_v55 = vadd.f32 %v822_v51, %v540_v43  ;;  %v941_v56 = vadd.f32 %v886_v52, %v556_v44  ;;  %v1964_v57 = vpop.f32.mrb[10].mxu0  ;;  %v1980_v58 = vpop.f32.mrb[10].mxu1  ;;  %v1019_v42 = vld [vmem:[%s2443_s17 + $0x8] sm:$0xff] (!%p1836_p13)  ;;  %v1004_v43 = vld [vmem:[#allocation2 + $0x90] sm:$0xff] (!%p1836_p13)  ;;  %1993 = vmatprep.mubr.msk.f32.mxu1 (!%p1836_p13), %vm949_vm1, %v1042_v39  ;;  %v1022_v51 = vld [vmem:[%s2443_s17 + $0x20] sm:$0xff] (!%p1836_p13) }
 0x151   : > { %960 = vst.msk [vmem:[#allocation2 + $0x50] sm:$0xff] %vm949_vm1, %v927_v49  ;;  %976 = vst.msk [vmem:[#allocation2 + $0xd0] sm:$0xff] %vm949_vm1, %v943_v50  ;;  %v928_v59 = vadd.f32 %v1964_v57, %v543_v47  ;;  %v944_v60 = vadd.f32 %v1980_v58, %v559_v48  ;;  %v825_v61 = vpop.f32.mrb[11].mxu0  ;;  %v889_v62 = vpop.f32.mrb[11].mxu1  ;;  %v1020_v44 = vld [vmem:[%s2443_s17 + $0x10] sm:$0xff] (!%p1836_p13)  ;;  %v1043_v45 = vmul.f32 (!%p1836_p13), %v1019_v42, %v1003_v41  ;;  %2056 = vmatpush3.bf16.msra.mxu1 (!%p1836_p13), %v2053_v33  ;;  %v1005_v47 = vld [vmem:[#allocation2 + $0x98] sm:$0xff] (!%p1836_p13) }
 0x152   : > { %958 = vst.msk [vmem:[#allocation2 + $0x40] sm:$0xff] %vm949_vm1, %v925_v55  ;;  %974 = vst.msk [vmem:[#allocation2 + $0xc0] sm:$0xff] %vm949_vm1, %v941_v56  ;;  %v926_v63 = vadd.f32 %v825_v61, %v541_v53  ;;  %v942_v0 = vadd.f32 %v889_v62, %v557_v54  ;;  %v1044_v46 = vmul.f32 (!%p1836_p13), %v1020_v44, %v1004_v43  ;;  %v1021_v48 = vld [vmem:[%s2443_s17 + $0x18] sm:$0xff] (!%p1836_p13)  ;;  %2064 = vmatpush3.bf16.msra.mxu0 (!%p1836_p13), %v2061_v37  ;;  %v987_v49 = vld [vmem:[#allocation2 + $0x8] sm:$0xff] (!%p1836_p13) }
 0x153   : > { %961 = vst.msk [vmem:[#allocation2 + $0x58] sm:$0xff] %vm949_vm1, %v928_v59  ;;  %977 = vst.msk [vmem:[#allocation2 + $0xd8] sm:$0xff] %vm949_vm1, %v944_v60  ;;  %v1006_v50 = vld [vmem:[#allocation2 + $0xa0] sm:$0xff] (!%p1836_p13)  ;;  %v988_v52 = vld [vmem:[#allocation2 + $0x10] sm:$0xff] (!%p1836_p13)  ;;  %v1045_v53 = vmul.f32 (!%p1836_p13), %v1021_v48, %v1005_v47 }
 0x154   : > { %959 = vst.msk [vmem:[#allocation2 + $0x48] sm:$0xff] %vm949_vm1, %v926_v63  ;;  %975 = vst.msk [vmem:[#allocation2 + $0xc8] sm:$0xff] %vm949_vm1, %v942_v0  ;;  %1994 = vmatmul.mubr.msk.f32.vlgmr.msra.gmra.mrb[0].mxu1 (!%p1836_p13), %vm949_vm1, %v1043_v45  ;;  %v1046_v54 = vmul.f32 (!%p1836_p13), %v1022_v51, %v1006_v50  ;;  %v1007_v55 = vld [vmem:[#allocation2 + $0xa8] sm:$0xff] (!%p1836_p13)  ;;  %v989_v57 = vld [vmem:[#allocation2 + $0x18] sm:$0xff] (!%p1836_p13) }
 0x155   : > { %2026 = vmatmul.mubr.msk.f32.vlgmr.msra.gmra.mrb[0].mxu0 (!%p1836_p13), %vm949_vm1, %v987_v49  ;;  %1996 = vmatprep.mubr.msk.f32.mxu1 (!%p1836_p13), %vm949_vm1, %v1044_v46  ;;  %v1023_v56 = vld [vmem:[%s2443_s17 + $0x28] sm:$0xff] (!%p1836_p13)  ;;  %v1008_v58 = vld [vmem:[#allocation2 + $0xb0] sm:$0xff] (!%p1836_p13)  ;;  %v990_v60 = vld [vmem:[#allocation2 + $0x20] sm:$0xff] (!%p1836_p13) }
 0x156   : > { %v1967_v5 = vpop.f32.mrb[12].mxu0  ;;  %v1983_v6 = vpop.f32.mrb[12].mxu1  ;;  %985 = sbr.rel (%p1836_p13) target bundleno = 753 (0x2f1), region = 89  ;;  %2028 = vmatprep.mubr.msk.f32.mxu0 (!%p1836_p13), %vm949_vm1, %v988_v52  ;;  %v1024_v59 = vld [vmem:[%s2443_s17 + $0x30] sm:$0xff] (!%p1836_p13)  ;;  %v1047_v61 = vmul.f32 (!%p1836_p13), %v1023_v56, %v1007_v55  ;;  %v1009_v63 = vld [vmem:[#allocation2 + $0xb8] sm:$0xff] (!%p1836_p13) }
 0x157   : > { %v931_v9 = vadd.f32 %v1967_v5, %v546_v1  ;;  %v947_v10 = vadd.f32 %v1983_v6, %v562_v2  ;;  %v838_v11 = vpop.f32.mrb[13].mxu0  ;;  %v902_v12 = vpop.f32.mrb[13].mxu1  ;;  %v1048_v62 = vmul.f32 (!%p1836_p13), %v1024_v59, %v1008_v58  ;;  %v1025_v0 = vld [vmem:[%s2443_s17 + $0x38] sm:$0xff] (!%p1836_p13)  ;;  %v991_v1 = vld [vmem:[#allocation2 + $0x28] sm:$0xff] (!%p1836_p13)  ;;  %v2622_v39 = vld [vmem:[%s2841_s4] ss:$0 sm:$0xff] (!%p1836_p13) }
 0x158   : > { %v929_v15 = vadd.f32 %v838_v11, %v544_v3  ;;  %v945_v16 = vadd.f32 %v902_v12, %v560_v4  ;;  %v1968_v17 = vpop.f32.mrb[14].mxu0  ;;  %v1984_v18 = vpop.f32.mrb[14].mxu1  ;;  %1997 = vmatmul.mubr.msk.f32.gmra.mrb[2].mxu1 (!%p1836_p13), %vm949_vm1, %v1045_v53  ;;  %v1026_v3 = vld [vmem:[%s2443_s17 + $0x40] sm:$0xff] (!%p1836_p13)  ;;  %v992_v4 = vld [vmem:[#allocation2 + $0x30] sm:$0xff] (!%p1836_p13)  ;;  %v1049_v5 = vmul.f32 (!%p1836_p13), %v1025_v0, %v1009_v63 }
 0x159   : > { %964 = vst.msk [vmem:[#allocation2 + $0x70] sm:$0xff] %vm949_vm1, %v931_v9  ;;  %980 = vst.msk [vmem:[#allocation2 + $0xf0] sm:$0xff] %vm949_vm1, %v947_v10  ;;  %v932_v19 = vadd.f32 %v1968_v17, %v547_v7  ;;  %v948_v20 = vadd.f32 %v1984_v18, %v563_v8  ;;  %v841_v21 = vpop.f32.mrb[15].mxu0  ;;  %v905_v22 = vpop.f32.mrb[15].mxu1  ;;  %2029 = vmatmul.mubr.msk.f32.gmra.mrb[2].mxu0 (!%p1836_p13), %vm949_vm1, %v989_v57  ;;  %1999 = vmatprep.mubr.msk.f32.mxu1 (!%p1836_p13), %vm949_vm1, %v1046_v54  ;;  %v1010_v2 = vld [vmem:[#allocation2 + $0xc0] sm:$0xff] (!%p1836_p13)  ;;  %v1027_v8 = vld [vmem:[%s2443_s17 + $0x48] sm:$0xff] (!%p1836_p13) }
 0x15a   : > { %962 = vst.msk [vmem:[#allocation2 + $0x60] sm:$0xff] %vm949_vm1, %v929_v15  ;;  %978 = vst.msk [vmem:[#allocation2 + $0xe0] sm:$0xff] %vm949_vm1, %v945_v16  ;;  %v930_v23 = vadd.f32 %v841_v21, %v545_v13  ;;  %v946_v24 = vadd.f32 %v905_v22, %v561_v14  ;;  %2031 = vmatprep.mubr.msk.f32.mxu0 (!%p1836_p13), %vm949_vm1, %v990_v60  ;;  %v1050_v6 = vmul.f32 (!%p1836_p13), %v1026_v3, %v1010_v2  ;;  %v993_v9 = vld [vmem:[#allocation2 + $0x38] sm:$0xff] (!%p1836_p13)  ;;  %v1012_v10 = vld [vmem:[#allocation2 + $0xd0] sm:$0xff] (!%p1836_p13) }
 0x15b   : > { %965 = vst.msk [vmem:[#allocation2 + $0x78] sm:$0xff] %vm949_vm1, %v932_v19  ;;  %981 = vst.msk [vmem:[#allocation2 + $0xf8] sm:$0xff] %vm949_vm1, %v948_v20  ;;  %v1011_v7 = vld [vmem:[#allocation2 + $0xc8] sm:$0xff] (!%p1836_p13)  ;;  %v1028_v11 = vld [vmem:[%s2443_s17 + $0x50] sm:$0xff] (!%p1836_p13) }
 0x15c   : > { %963 = vst.msk [vmem:[#allocation2 + $0x68] sm:$0xff] %vm949_vm1, %v930_v23  ;;  %979 = vst.msk [vmem:[#allocation2 + $0xe8] sm:$0xff] %vm949_vm1, %v946_v24  ;;  %2000 = vmatmul.mubr.msk.f32.gmra.mrb[4].mxu1 (!%p1836_p13), %vm949_vm1, %v1047_v61  ;;  %v994_v12 = vld [vmem:[#allocation2 + $0x40] sm:$0xff] (!%p1836_p13)  ;;  %v1051_v13 = vmul.f32 (!%p1836_p13), %v1027_v8, %v1011_v7  ;;  %v1052_v14 = vmul.f32 (!%p1836_p13), %v1028_v11, %v1012_v10  ;;  %v1013_v15 = vld [vmem:[#allocation2 + $0xd8] sm:$0xff] (!%p1836_p13) }
 0x15d   : > { %2032 = vmatmul.mubr.msk.f32.gmra.mrb[4].mxu0 %vm949_vm1, %v991_v1  ;;  %2002 = vmatprep.mubr.msk.f32.mxu1 %vm949_vm1, %v1048_v62  ;;  %v1029_v16 = vld [vmem:[%s2443_s17 + $0x58] sm:$0xff]  ;;  %v995_v17 = vld [vmem:[#allocation2 + $0x48] sm:$0xff]  ;;  %v1030_v19 = vld [vmem:[%s2443_s17 + $0x60] sm:$0xff] }
 0x15e   : > { %2034 = vmatprep.mubr.msk.f32.mxu0 %vm949_vm1, %v992_v4  ;;  %v996_v20 = vld [vmem:[#allocation2 + $0x50] sm:$0xff]  ;;  %v1053_v21 = vmul.f32 %v1029_v16, %v1013_v15  ;;  %v1031_v24 = vld [vmem:[%s2443_s17 + $0x68] sm:$0xff]  ;;  %v997_v25 = vld [vmem:[#allocation2 + $0x58] sm:$0xff] }
 0x160   : > { %2003 = vmatmul.mubr.msk.f32.gmra.mrb[6].mxu1 %vm949_vm1, %v1049_v5  ;;  %v1016_v26 = vld [vmem:[#allocation2 + $0xf0] sm:$0xff] }
 0x161   : > { %2035 = vmatmul.mubr.msk.f32.gmra.mrb[6].mxu0 %vm949_vm1, %v993_v9  ;;  %2005 = vmatprep.mubr.msk.f32.mxu1 %vm949_vm1, %v1050_v6  ;;  %v1014_v18 = vld [vmem:[#allocation2 + $0xe0] sm:$0xff]  ;;  %v1056_v30 = vmul.f32 %v1032_v27, %v1016_v26  ;;  %v1000_v34 = vld [vmem:[#allocation2 + $0x70] sm:$0xff] }
 0x162   : > { %2037 = vmatprep.mubr.msk.f32.mxu0 %vm949_vm1, %v994_v12  ;;  %v1054_v22 = vmul.f32 %v1030_v19, %v1014_v18  ;;  %v998_v28 = vld [vmem:[#allocation2 + $0x60] sm:$0xff]  ;;  %v1017_v31 = vld [vmem:[#allocation2 + $0xf8] sm:$0xff] }
 0x163   : > { %v1015_v23 = vld [vmem:[#allocation2 + $0xe8] sm:$0xff]  ;;  %v1057_v35 = vmul.f32 %v1033_v32, %v1017_v31  ;;  %v1001_v36 = vld [vmem:[#allocation2 + $0x78] sm:$0xff] }
 0x164   : > { %2006 = vmatmul.mubr.msk.f32.gmra.mrb[8].mxu1 %vm949_vm1, %v1051_v13  ;;  %v1055_v29 = vmul.f32 %v1031_v24, %v1015_v23  ;;  %v999_v33 = vld [vmem:[#allocation2 + $0x68] sm:$0xff] }
 0x165   : > { %2038 = vmatmul.mubr.msk.f32.gmra.mrb[8].mxu0 %vm949_vm1, %v995_v17  ;;  %2008 = vmatprep.mubr.msk.f32.mxu1 %vm949_vm1, %v1052_v14 }
 0x166   : > { %2040 = vmatprep.mubr.msk.f32.mxu0 %vm949_vm1, %v996_v20 }
 0x168   : > { %2009 = vmatmul.mubr.msk.f32.gmra.mrb[10].mxu1 %vm949_vm1, %v1053_v21 }
 0x169   : > { %2041 = vmatmul.mubr.msk.f32.gmra.mrb[10].mxu0 %vm949_vm1, %v997_v25  ;;  %2011 = vmatprep.mubr.msk.f32.mxu1 %vm949_vm1, %v1054_v22 }
 0x16a   : > { %2043 = vmatprep.mubr.msk.f32.mxu0 %vm949_vm1, %v998_v28 }
 0x16c   : > { %2012 = vmatmul.mubr.msk.f32.gmra.mrb[12].mxu1 %vm949_vm1, %v1055_v29 }
 0x16d   : > { %2044 = vmatmul.mubr.msk.f32.gmra.mrb[12].mxu0 %vm949_vm1, %v999_v33  ;;  %2014 = vmatprep.mubr.msk.f32.mxu1 %vm949_vm1, %v1056_v30 }
 0x16e   : > { %2046 = vmatprep.mubr.msk.f32.mxu0 %vm949_vm1, %v1000_v34 }
 0x170   : > { %2015 = vmatmul.mubr.msk.f32.gmra.mrb[14].mxu1 %vm949_vm1, %v1057_v35 }
 0x171   : > { %2047 = vmatmul.mubr.msk.f32.gmra.mrb[14].mxu0 %vm949_vm1, %v1001_v36 }
 0x227   : > { %v1995_v37 = vpop.f32.mrb[0].mxu1 }
 0x228   : > { %v2027_v38 = vpop.f32.mrb[0].mxu0  ;;  %v1172_v40 = vpop.f32.mrb[1].mxu1 }
 0x229   : > { %v1371_v41 = vadd.f32 %v2027_v38, %v1995_v37  ;;  %v1365_v42 = vpop.f32.mrb[1].mxu0 }
 0x22a   : > { %v1366_v43 = vadd.f32 %v1365_v42, %v1172_v40 }
 0x22b   : > { %v1452_v44 = vadd.f32 %v2622_v39, %v1371_v41  ;;  %v1998_v45 = vpop.f32.mrb[2].mxu1 }
 0x22c   : > { %v1451_v46 = vadd.f32 %v2622_v39, %v1366_v43  ;;  %v2030_v47 = vpop.f32.mrb[2].mxu0  ;;  %v1182_v48 = vpop.f32.mrb[3].mxu1 }
 0x22d   : > { %v1381_v49 = vadd.f32 %v2030_v47, %v1998_v45  ;;  %v1375_v50 = vpop.f32.mrb[3].mxu0  ;;  %vm1468_vm2 = vcmp.ge.f32.partialorder %v1452_v44, 0.0  ;;  %v1484_v51 = vmul.f32 0.2, %v1452_v44 }
 0x22e   : > { %v1483_v52 = vmul.f32 0.2, %v1451_v46  ;;  %v1376_v53 = vadd.f32 %v1375_v50, %v1182_v48  ;;  %vm1467_vm3 = vcmp.ge.f32.partialorder %v1451_v46, 0.0 }
 0x22f   : > { %v1454_v54 = vadd.f32 %v2622_v39, %v1381_v49  ;;  %v2001_v55 = vpop.f32.mrb[4].mxu1  ;;  %v2627_v56 = vsel %vm1468_vm2, %v1452_v44, %v1484_v51 }
 0x230   : > { %v1453_v57 = vadd.f32 %v2622_v39, %v1376_v53  ;;  %v2033_v58 = vpop.f32.mrb[4].mxu0  ;;  %v1192_v59 = vpop.f32.mrb[5].mxu1  ;;  %v1532_v60 = vmul.f32 %v2627_v56, %v2627_v56  ;;  %1516 = vst.msk [vmem:[%s2448_s19 + $0x8] sm:$0xff] %vm949_vm1, %v2627_v56  ;;  %v2635_v61 = vsel %vm1467_vm3, %v1451_v46, %v1483_v52 }
 0x231   : > { %v1391_v62 = vadd.f32 %v2033_v58, %v2001_v55  ;;  %v1385_v63 = vpop.f32.mrb[5].mxu0  ;;  %vm1470_vm4 = vcmp.ge.f32.partialorder %v1454_v54, 0.0  ;;  %v1486_v0 = vmul.f32 0.2, %v1454_v54  ;;  %v1531_v1 = vmul.f32 %v2635_v61, %v2635_v61  ;;  %1515 = vst.msk [vmem:[%s2448_s19] sm:$0xff] %vm949_vm1, %v2635_v61 }
 0x232   : > { %v1485_v2 = vmul.f32 0.2, %v1453_v57  ;;  %v1386_v3 = vadd.f32 %v1385_v63, %v1192_v59  ;;  %v1550_v4 = vsel %vm949_vm1, %v1532_v60, 0.0  ;;  %vm1469_vm5 = vcmp.ge.f32.partialorder %v1453_v57, 0.0 }
 0x233   : > { %v1456_v5 = vadd.f32 %v2622_v39, %v1391_v62  ;;  %1551 = vadd.xlane.f32.xlu0 %v1550_v4  ;;  %v2004_v6 = vpop.f32.mrb[6].mxu1  ;;  %v2644_v7 = vsel %vm1470_vm4, %v1454_v54, %v1486_v0  ;;  %v1547_v12 = vsel %vm949_vm1, %v1531_v1, 0.0 }
 0x234   : > { %v1455_v8 = vadd.f32 %v2622_v39, %v1386_v3  ;;  %v2036_v9 = vpop.f32.mrb[6].mxu0  ;;  %v1202_v10 = vpop.f32.mrb[7].mxu1  ;;  %v1534_v11 = vmul.f32 %v2644_v7, %v2644_v7  ;;  %1518 = vst.msk [vmem:[%s2448_s19 + $0x18] sm:$0xff] %vm949_vm1, %v2644_v7  ;;  %v2653_v13 = vsel %vm1469_vm5, %v1453_v57, %v1485_v2 }
 0x235   : > { %v1488_v14 = vmul.f32 0.2, %v1456_v5  ;;  %v1401_v15 = vadd.f32 %v2036_v9, %v2004_v6  ;;  %v1395_v16 = vpop.f32.mrb[7].mxu0  ;;  %v1533_v17 = vmul.f32 %v2653_v13, %v2653_v13  ;;  %1517 = vst.msk [vmem:[%s2448_s19 + $0x10] sm:$0xff] %vm949_vm1, %v2653_v13  ;;  %vm1472_vm6 = vcmp.ge.f32.partialorder %v1456_v5, 0.0 }
 0x236   : > { %v1487_v18 = vmul.f32 0.2, %v1455_v8  ;;  %v1396_v19 = vadd.f32 %v1395_v16, %v1202_v10  ;;  %v1556_v20 = vsel %vm949_vm1, %v1534_v11, 0.0  ;;  %vm1471_vm7 = vcmp.ge.f32.partialorder %v1455_v8, 0.0 }
 0x237   : > { %v1458_v21 = vadd.f32 %v2622_v39, %v1401_v15  ;;  %1557 = vadd.xlane.f32.xlu1 %v1556_v20  ;;  %1548 = vadd.xlane.f32.xlu0 %v1547_v12  ;;  %v2007_v22 = vpop.f32.mrb[8].mxu1  ;;  %v2662_v23 = vsel %vm1472_vm6, %v1456_v5, %v1488_v14  ;;  %v1553_v35 = vsel %vm949_vm1, %v1533_v17, 0.0 }
 0x238   : > { %v1457_v24 = vadd.f32 %v2622_v39, %v1396_v19  ;;  %v2039_v25 = vpop.f32.mrb[8].mxu0  ;;  %v1212_v26 = vpop.f32.mrb[9].mxu1  ;;  %v2665_v27 = vsel %vm1471_vm7, %v1455_v8, %v1487_v18  ;;  %1520 = vst.msk [vmem:[%s2448_s19 + $0x28] sm:$0xff] %vm949_vm1, %v2662_v23  ;;  %v1536_v28 = vmul.f32 %v2662_v23, %v2662_v23 }
 0x239   : > { %v1490_v29 = vmul.f32 0.2, %v1458_v21  ;;  %v1411_v30 = vadd.f32 %v2039_v25, %v2007_v22  ;;  %v1405_v31 = vpop.f32.mrb[9].mxu0  ;;  %1519 = vst.msk [vmem:[%s2448_s19 + $0x20] sm:$0xff] %vm949_vm1, %v2665_v27  ;;  %v1535_v32 = vmul.f32 %v2665_v27, %v2665_v27  ;;  %vm1474_vm8 = vcmp.ge.f32.partialorder %v1458_v21, 0.0 }
 0x23a   : > { %v1489_v33 = vmul.f32 0.2, %v1457_v24  ;;  %v1406_v34 = vadd.f32 %v1405_v31, %v1212_v26  ;;  %vm1473_vm9 = vcmp.ge.f32.partialorder %v1457_v24, 0.0  ;;  %v1562_v44 = vsel %vm949_vm1, %v1536_v28, 0.0 }
 0x23b   : > { %v1460_v36 = vadd.f32 %v2622_v39, %v1411_v30  ;;  %1554 = vadd.xlane.f32.xlu1 %v1553_v35  ;;  %v2010_v37 = vpop.f32.mrb[10].mxu1  ;;  %v1559_v38 = vsel %vm949_vm1, %v1535_v32, 0.0  ;;  %v2680_v40 = vsel %vm1474_vm8, %v1458_v21, %v1490_v29 }
 0x23c   : > { %v1459_v41 = vadd.f32 %v2622_v39, %v1406_v34  ;;  %v2042_v42 = vpop.f32.mrb[10].mxu0  ;;  %1560 = vadd.xlane.f32.xlu0 %v1559_v38  ;;  %v1222_v43 = vpop.f32.mrb[11].mxu1  ;;  %v2684_v45 = vsel %vm1473_vm9, %v1457_v24, %v1489_v33  ;;  %1522 = vst.msk [vmem:[%s2448_s19 + $0x38] sm:$0xff] %vm949_vm1, %v2680_v40  ;;  %v1538_v52 = vmul.f32 %v2680_v40, %v2680_v40 }
 0x23d   : > { %v1492_v46 = vmul.f32 0.2, %v1460_v36  ;;  %v1421_v47 = vadd.f32 %v2042_v42, %v2010_v37  ;;  %v1415_v48 = vpop.f32.mrb[11].mxu0  ;;  %1521 = vst.msk [vmem:[%s2448_s19 + $0x30] sm:$0xff] %vm949_vm1, %v2684_v45  ;;  %v1537_v49 = vmul.f32 %v2684_v45, %v2684_v45  ;;  %vm1476_vm10 = vcmp.ge.f32.partialorder %v1460_v36, 0.0 }
 0x23e   : > { %v1491_v50 = vmul.f32 0.2, %v1459_v41  ;;  %v1416_v51 = vadd.f32 %v1415_v48, %v1222_v43  ;;  %vm1475_vm11 = vcmp.ge.f32.partialorder %v1459_v41, 0.0  ;;  %v1568_v6 = vsel %vm949_vm1, %v1538_v52, 0.0 }
 0x23f   : > { %v1462_v53 = vadd.f32 %v2622_v39, %v1421_v47  ;;  %1563 = vadd.xlane.f32.xlu1 %v1562_v44  ;;  %v2013_v54 = vpop.f32.mrb[12].mxu1  ;;  %v1565_v55 = vsel %vm949_vm1, %v1537_v49, 0.0  ;;  %v2698_v57 = vsel %vm1476_vm10, %v1460_v36, %v1492_v46 }
 0x240   : > { %v1461_v58 = vadd.f32 %v2622_v39, %v1416_v51  ;;  %v2045_v59 = vpop.f32.mrb[12].mxu0  ;;  %1566 = vadd.xlane.f32.xlu0 %v1565_v55  ;;  %v1232_v60 = vpop.f32.mrb[13].mxu1  ;;  %v2701_v62 = vsel %vm1475_vm11, %v1459_v41, %v1491_v50  ;;  %1524 = vst.msk [vmem:[%s2448_s19 + $0x48] sm:$0xff] %vm949_vm1, %v2698_v57  ;;  %v1540_v63 = vmul.f32 %v2698_v57, %v2698_v57 }
 0x241   : > { %v1494_v0 = vmul.f32 0.2, %v1462_v53  ;;  %v1431_v1 = vadd.f32 %v2045_v59, %v2013_v54  ;;  %v1425_v2 = vpop.f32.mrb[13].mxu0  ;;  %1523 = vst.msk [vmem:[%s2448_s19 + $0x40] sm:$0xff] %vm949_vm1, %v2701_v62  ;;  %v1539_v3 = vmul.f32 %v2701_v62, %v2701_v62  ;;  %vm1478_vm12 = vcmp.ge.f32.partialorder %v1462_v53, 0.0 }
 0x242   : > { %v1493_v4 = vmul.f32 0.2, %v1461_v58  ;;  %v1426_v5 = vadd.f32 %v1425_v2, %v1232_v60  ;;  %vm1477_vm13 = vcmp.ge.f32.partialorder %v1461_v58, 0.0  ;;  %v1574_v16 = vsel %vm949_vm1, %v1540_v63, 0.0 }
 0x243   : > { %v1464_v8 = vadd.f32 %v2622_v39, %v1431_v1  ;;  %1569 = vadd.xlane.f32.xlu1 %v1568_v6  ;;  %v2016_v9 = vpop.f32.mrb[14].mxu1  ;;  %v1571_v10 = vsel %vm949_vm1, %v1539_v3, 0.0  ;;  %v2716_v11 = vsel %vm1478_vm12, %v1462_v53, %v1494_v0 }
 0x244   : > { %v1463_v12 = vadd.f32 %v2622_v39, %v1426_v5  ;;  %v2048_v14 = vpop.f32.mrb[14].mxu0  ;;  %1572 = vadd.xlane.f32.xlu0 %v1571_v10  ;;  %v1242_v15 = vpop.f32.mrb[15].mxu1  ;;  %v2720_v17 = vsel %vm1477_vm13, %v1461_v58, %v1493_v4  ;;  %1526 = vst.msk [vmem:[%s2448_s19 + $0x58] sm:$0xff] %vm949_vm1, %v2716_v11  ;;  %v1542_v25 = vmul.f32 %v2716_v11, %v2716_v11 }
 0x245   : > { %v1496_v18 = vmul.f32 0.2, %v1464_v8  ;;  %v1441_v19 = vadd.f32 %v2048_v14, %v2016_v9  ;;  %v1435_v20 = vpop.f32.mrb[15].mxu0  ;;  %1525 = vst.msk [vmem:[%s2448_s19 + $0x50] sm:$0xff] %vm949_vm1, %v2720_v17  ;;  %v1541_v21 = vmul.f32 %v2720_v17, %v2720_v17  ;;  %vm1480_vm14 = vcmp.ge.f32.partialorder %v1464_v8, 0.0 }
 0x246   : > { %v1495_v22 = vmul.f32 0.2, %v1463_v12  ;;  %v1436_v24 = vadd.f32 %v1435_v20, %v1242_v15  ;;  %vm1479_vm15 = vcmp.ge.f32.partialorder %v1463_v12, 0.0  ;;  %v1580_v35 = vsel %vm949_vm1, %v1542_v25, 0.0 }
 0x247   : > { %v1466_v26 = vadd.f32 %v2622_v39, %v1441_v19  ;;  %1575 = vadd.xlane.f32.xlu1 %v1574_v16  ;;  %v1577_v28 = vsel %vm949_vm1, %v1541_v21, 0.0  ;;  %v2734_v29 = vsel %vm1480_vm14, %v1464_v8, %v1496_v18 }
 0x248   : > { %v1465_v30 = vadd.f32 %v2622_v39, %v1436_v24  ;;  %1578 = vadd.xlane.f32.xlu0 %v1577_v28  ;;  %v2737_v31 = vsel %vm1479_vm15, %v1463_v12, %v1495_v22  ;;  %1528 = vst.msk [vmem:[%s2448_s19 + $0x68] sm:$0xff] %vm949_vm1, %v2734_v29  ;;  %v1544_v39 = vmul.f32 %v2734_v29, %v2734_v29 }
 0x249   : > { %v1498_v32 = vmul.f32 0.2, %v1466_v26  ;;  %1527 = vst.msk [vmem:[%s2448_s19 + $0x60] sm:$0xff] %vm949_vm1, %v2737_v31  ;;  %v1543_v33 = vmul.f32 %v2737_v31, %v2737_v31  ;;  %vm1482_vm0 = vcmp.ge.f32.partialorder %v1466_v26, 0.0 }
 0x24a   : > { %v1497_v34 = vmul.f32 0.2, %v1465_v30  ;;  %vm1481_vm2 = vcmp.ge.f32.partialorder %v1465_v30, 0.0  ;;  %v1586_v42 = vsel %vm949_vm1, %v1544_v39, 0.0 }
 0x24b   : > { %1581 = vadd.xlane.f32.xlu1 %v1580_v35  ;;  %v1583_v36 = vsel %vm949_vm1, %v1543_v33, 0.0  ;;  %v2751_v37 = vsel %vm1482_vm0, %v1466_v26, %v1498_v32 }
 0x24c   : > { %1584 = vadd.xlane.f32.xlu0 %v1583_v36  ;;  %v2753_v38 = vsel %vm1481_vm2, %v1465_v30, %v1497_v34  ;;  %1530 = vst.msk [vmem:[%s2448_s19 + $0x78] sm:$0xff] %vm949_vm1, %v2751_v37  ;;  %v1546_v43 = vmul.f32 %v2751_v37, %v2751_v37 }
 0x24d   : > { %1529 = vst.msk [vmem:[%s2448_s19 + $0x70] sm:$0xff] %vm949_vm1, %v2753_v38  ;;  %v1545_v41 = vmul.f32 %v2753_v38, %v2753_v38 }
 0x24e   : > { %v1592_v46 = vsel %vm949_vm1, %v1546_v43, 0.0 }
 0x24f   : > { %1587 = vadd.xlane.f32.xlu1 %v1586_v42  ;;  %v1589_v44 = vsel %vm949_vm1, %v1545_v41, 0.0 }
 0x250   : > { %1590 = vadd.xlane.f32.xlu0 %v1589_v44 }
 0x253   : > { %1593 = vadd.xlane.f32.xlu1 %v1592_v46 }
 0x2c0   : > { %v1552_v47 = vpop.xlane.xlu0 %1551 }
 0x2c1   : > { %v1596_v48 = vmax.f32 %v1552_v47, 1e-24 }
 0x2c3   : > { %2178 = vrsqrt.f32 %v1596_v48 }
 0x2c4   : > { %v1558_v49 = vpop.xlane.xlu1 %1557  ;;  %v1549_v50 = vpop.xlane.xlu0 %1548 }
 0x2c5   : > { %v1598_v51 = vmax.f32 %v1558_v49, 1e-24  ;;  %v1595_v52 = vmax.f32 %v1549_v50, 1e-24 }
 0x2c7   : > { %2180 = vrsqrt.f32 %v1598_v51 }
 0x2c8   : > { %2182 = vrsqrt.f32 %v1595_v52  ;;  %v1555_v53 = vpop.xlane.xlu1 %1554 }
 0x2c9   : > { %v1597_v54 = vmax.f32 %v1555_v53, 1e-24  ;;  %v1561_v55 = vpop.xlane.xlu0 %1560 }
 0x2ca   : > { %v1599_v58 = vmax.f32 %v1561_v55, 1e-24 }
 0x2cb   : > { %2184 = vrsqrt.f32 %v1597_v54 }
 0x2cc   : > { %2186 = vrsqrt.f32 %v1599_v58  ;;  %v1564_v59 = vpop.xlane.xlu1 %1563 }
 0x2cd   : > { %v2179_v60 = vpop.eup %2178  ;;  %v1600_v63 = vmax.f32 %v1564_v59, 1e-24  ;;  %v1567_v0 = vpop.xlane.xlu0 %1566 }
 0x2ce   : > { %v1628_v1 = vmul.f32 %v2179_v60, %v2627_v56  ;;  %v1601_v2 = vmax.f32 %v1567_v0, 1e-24 }
 0x2cf   : > { %2188 = vrsqrt.f32 %v1600_v63 }
 0x2d0   : > { %1644 = vst.msk [vmem:[%s2453_s30 + $0x8] sm:$0xff] %vm949_vm1, %v1628_v1  ;;  %2190 = vrsqrt.f32 %v1601_v2  ;;  %v1570_v3 = vpop.xlane.xlu1 %1569 }
 0x2d1   : > { %v2181_v4 = vpop.eup %2180  ;;  %v1602_v5 = vmax.f32 %v1570_v3, 1e-24  ;;  %v1573_v6 = vpop.xlane.xlu0 %1572 }
 0x2d2   : > { %v2183_v8 = vpop.eup %2182  ;;  %v1630_v9 = vmul.f32 %v2181_v4, %v2644_v7  ;;  %v1603_v10 = vmax.f32 %v1573_v6, 1e-24 }
 0x2d3   : > { %v1627_v12 = vmul.f32 %v2183_v8, %v2635_v61  ;;  %2192 = vrsqrt.f32 %v1602_v5 }
 0x2d4   : > { %1646 = vst.msk [vmem:[%s2453_s30 + $0x18] sm:$0xff] %vm949_vm1, %v1630_v9  ;;  %2194 = vrsqrt.f32 %v1603_v10  ;;  %v1576_v56 = vpop.xlane.xlu1 %1575 }
 0x2d5   : > { %v2185_v14 = vpop.eup %2184  ;;  %1643 = vst.msk [vmem:[%s2453_s30] sm:$0xff] %vm949_vm1, %v1627_v12  ;;  %v1604_v15 = vmax.f32 %v1576_v56, 1e-24  ;;  %v1579_v16 = vpop.xlane.xlu0 %1578 }
 0x2d6   : > { %v2187_v18 = vpop.eup %2186  ;;  %v1629_v19 = vmul.f32 %v2185_v14, %v2653_v13  ;;  %v1605_v7 = vmax.f32 %v1579_v16, 1e-24 }
 0x2d7   : > { %v1631_v20 = vmul.f32 %v2187_v18, %v2665_v27  ;;  %2196 = vrsqrt.f32 %v1604_v15 }
 0x2d8   : > { %1645 = vst.msk [vmem:[%s2453_s30 + $0x10] sm:$0xff] %vm949_vm1, %v1629_v19  ;;  %2198 = vrsqrt.f32 %v1605_v7  ;;  %v1582_v61 = vpop.xlane.xlu1 %1581 }
 0x2d9   : > { %v2189_v21 = vpop.eup %2188  ;;  %1647 = vst.msk [vmem:[%s2453_s30 + $0x20] sm:$0xff] %vm949_vm1, %v1631_v20  ;;  %v1606_v22 = vmax.f32 %v1582_v61, 1e-24  ;;  %v1585_v24 = vpop.xlane.xlu0 %1584 }
 0x2da   : > { %v2191_v25 = vpop.eup %2190  ;;  %v1632_v26 = vmul.f32 %v2189_v21, %v2662_v23  ;;  %v1607_v13 = vmax.f32 %v1585_v24, 1e-24 }
 0x2db   : > { %v1633_v28 = vmul.f32 %v2191_v25, %v2684_v45  ;;  %2200 = vrsqrt.f32 %v1606_v22 }
 0x2dc   : > { %1648 = vst.msk [vmem:[%s2453_s30 + $0x28] sm:$0xff] %vm949_vm1, %v1632_v26  ;;  %2202 = vrsqrt.f32 %v1607_v13  ;;  %v1588_v27 = vpop.xlane.xlu1 %1587 }
 0x2dd   : > { %v2193_v30 = vpop.eup %2192  ;;  %1649 = vst.msk [vmem:[%s2453_s30 + $0x30] sm:$0xff] %vm949_vm1, %v1633_v28  ;;  %v1608_v32 = vmax.f32 %v1588_v27, 1e-24  ;;  %v1591_v33 = vpop.xlane.xlu0 %1590 }
 0x2de   : > { %v2195_v34 = vpop.eup %2194  ;;  %v1634_v35 = vmul.f32 %v2193_v30, %v2680_v40  ;;  %v1609_v23 = vmax.f32 %v1591_v33, 1e-24 }
 0x2df   : > { %v1635_v39 = vmul.f32 %v2195_v34, %v2701_v62  ;;  %2204 = vrsqrt.f32 %v1608_v32 }
 0x2e0   : > { %1650 = vst.msk [vmem:[%s2453_s30 + $0x38] sm:$0xff] %vm949_vm1, %v1634_v35  ;;  %2206 = vrsqrt.f32 %v1609_v23  ;;  %v1594_v45 = vpop.xlane.xlu1 %1593 }
 0x2e1   : > { %v2197_v36 = vpop.eup %2196  ;;  %1651 = vst.msk [vmem:[%s2453_s30 + $0x40] sm:$0xff] %vm949_vm1, %v1635_v39  ;;  %v1610_v41 = vmax.f32 %v1594_v45, 1e-24 }
 0x2e2   : > { %v2199_v42 = vpop.eup %2198  ;;  %v1636_v43 = vmul.f32 %v2197_v36, %v2698_v57 }
 0x2e3   : > { %v1637_v40 = vmul.f32 %v2199_v42, %v2720_v17  ;;  %2208 = vrsqrt.f32 %v1610_v41 }
 0x2e4   : > { %1652 = vst.msk [vmem:[%s2453_s30 + $0x48] sm:$0xff] %vm949_vm1, %v1636_v43 }
 0x2e5   : > { %v2201_v62 = vpop.eup %2200  ;;  %1653 = vst.msk [vmem:[%s2453_s30 + $0x50] sm:$0xff] %vm949_vm1, %v1637_v40 }
 0x2e6   : > { %v2203_v44 = vpop.eup %2202  ;;  %v1638_v46 = vmul.f32 %v2201_v62, %v2716_v11 }
 0x2e7   : > { %v1639_v47 = vmul.f32 %v2203_v44, %v2737_v31 }
 0x2e8   : > { %1654 = vst.msk [vmem:[%s2453_s30 + $0x58] sm:$0xff] %vm949_vm1, %v1638_v46 }
 0x2e9   : > { %v2205_v48 = vpop.eup %2204  ;;  %1655 = vst.msk [vmem:[%s2453_s30 + $0x60] sm:$0xff] %vm949_vm1, %v1639_v47 }
 0x2ea   : > { %v2207_v57 = vpop.eup %2206  ;;  %v1640_v17 = vmul.f32 %v2205_v48, %v2734_v29 }
 0x2eb   : > { %v1641_v49 = vmul.f32 %v2207_v57, %v2753_v38 }
 0x2ec   : > { %1656 = vst.msk [vmem:[%s2453_s30 + $0x68] sm:$0xff] %vm949_vm1, %v1640_v17 }
 0x2ed   : > { %v2209_v50 = vpop.eup %2208  ;;  %1657 = vst.msk [vmem:[%s2453_s30 + $0x70] sm:$0xff] %vm949_vm1, %v1641_v49 }
 0x2ee   : > { %v1642_v51 = vmul.f32 %v2209_v50, %v2751_v37 }
 0x2f0   : > { %1658 = vst.msk [vmem:[%s2453_s30 + $0x78] sm:$0xff] %vm949_vm1, %v1642_v51 }
 0x2f1 PF: > { %s17_s27 = sadd.s32 1, %s2264_s27   ;;  %s2844_s21 = smov %s2244_s22 }
 0x2f2   : > { %p14_p0 = scmp.ge.s32.totalorder %s17_s27, 6   ;;  %s2845_s22 = smov %s2353_s10 }
 0x2f3   : > { %s2846_s23 = smov %s2256_s25  ;;  %s2847_s24 = smov %s2260_s26 }
 0x2f4   : > { %s2848_s25 = smov %s2851_s28  ;;  %s2849_s26 = smov %s2855_s29 }
 0x2f5   :  { %16 = sbr.rel (!%p14_p0) target bundleno = 4 (0x4), region = 142 }

</bundles_post_ra>
